<compile_context>
chip_gen: v5e
topology: v5e:2x2
jax: 0.10.0
libtpu: 0.0.40
codegen_flags: <defaults>
</compile_context>

<pallas_src>
import jax
import jax.numpy as jnp
import numpy as np
from jax.experimental import pallas as pl
from jax.experimental.pallas import tpu as pltpu

HIDDEN = 100        # PyTorch hidden size
HIDDEN_PAD = 128    # lane-padded hidden size used inside the kernel
FC1_DIM = 128
BATCH_TILE = 8      # sublane-aligned batch rows per grid step


# ------------------------- fused LSTM + head kernel ---------------------------
def _lstm_head_kernel(x_ref, wih_ref, b_ref, whh_ref, w1_ref, b1_ref, w2_ref, b2_ref,
                      out_ref, xw_ref, h_ref, c_ref):
    """Grid = (batch_tiles, time_tiles); time axis is the sequential recurrence.

    x_ref  : (TT*8, CP)   raw input tile (time-major, 8 batch rows, padded channels)
    wih_ref: (CP, 4*HP)   input->gate weights (gate-blocked lanes, zero padded)
    b_ref  : (1, 4*HP)    fused bias b_ih + b_hh (zero padded)
    whh_ref: (HP, 4*HP)   recurrent weights, bf16, VMEM-resident across the whole sweep
    w1/b1  : fc1 (HP,128)/(1,128), w2/b2: fc2 (128,NC)/(1,NC)
    out_ref: (8, NC)      logits for this batch tile (written on the last time tile)
    xw_ref : VMEM scratch (TT*8, 4*HP)  per-tile input projection
    h_ref/c_ref: VMEM scratch (8, HP)   state carried across time tiles
    """
    t_idx = pl.program_id(1)
    n_t = pl.num_programs(1)
    BP, HP = h_ref.shape
    TT = xw_ref.shape[0] // BP

    # (Re-)initialize the carried state at the start of each batch tile's time sweep.
    @pl.when(t_idx == 0)
    def _():
        h_ref[...] = jnp.zeros_like(h_ref)
        c_ref[...] = jnp.zeros_like(c_ref)

    # Input projection for the whole time tile (off the serial dependence chain):
    # (TT*8, CP) @ (CP, 4*HP) + bias, kept in VMEM scratch to bound vreg liveness.
    xw_ref[...] = (
        jnp.dot(x_ref[...], wih_ref[...], preferred_element_type=jnp.float32)
        + b_ref[...])

    whh = whh_ref[...]          # (HP, 4*HP) bf16, read once, resident across the loop
    h = h_ref[...]
    c = c_ref[...]

    # Static unroll inside the (small) time tile; long sequences are handled by the grid,
    # which bounds code size / register pressure (perf-review item on fori_loop vs unroll).
    for t in range(TT):
        gates = xw_ref[t * BP:(t + 1) * BP, :] + jnp.dot(
            h.astype(jnp.bfloat16), whh, preferred_element_type=jnp.float32)  # (8, 4*HP)
        i_g = jax.nn.sigmoid(gates[:, 0 * HP:1 * HP])
        f_g = jax.nn.sigmoid(gates[:, 1 * HP:2 * HP])
        g_g = jnp.tanh(gates[:, 2 * HP:3 * HP])
        o_g = jax.nn.sigmoid(gates[:, 3 * HP:4 * HP])
        c = f_g * c + i_g * g_g
        h = o_g * jnp.tanh(c)
        # Padded lanes (100..127) stay exactly 0: padded gate columns/bias are 0 (exact in
        # bf16 too) -> gate pre-activations 0 -> c_pad stays 0, h_pad = 0.5*tanh(0) = 0.

    h_ref[...] = h
    c_ref[...] = c

    # dropout(0.5) -> identity in eval mode; fused MLP head on the final hidden state.
    @pl.when(t_idx == n_t - 1)
    def _():
        z1 = jnp.dot(h, w1_ref[...], preferred_element_type=jnp.float32) + b1_ref[...]
        z1 = jnp.maximum(z1, 0.0)
        z2 = jnp.dot(z1, w2_ref[...], preferred_element_type=jnp.float32) + b2_ref[...]
        out_ref[...] = z2.astype(out_ref.dtype)


# ------------------------------ parameter init --------------------------------
def init_params(key, in_channels, num_classes):
    """PyTorch-layout parameters (what nn.LSTM / nn.Linear would hold)."""
    H = HIDDEN
    ks = jax.random.split(key, 8)
    k_lstm = 1.0 / np.sqrt(H)
    k_fc1 = 1.0 / np.sqrt(H)
    k_fc2 = 1.0 / np.sqrt(FC1_DIM)
    u = lambda k, shape, bound: jax.random.uniform(
        k, shape, jnp.float32, minval=-bound, maxval=bound)
    return {
        "w_ih": u(ks[0], (4 * H, in_channels), k_lstm),   # (4H, C), gate order (i,f,g,o)
        "w_hh": u(ks[1], (4 * H, H), k_lstm),             # (4H, H)
        "b_ih": u(ks[2], (4 * H,), k_lstm),
        "b_hh": u(ks[3], (4 * H,), k_lstm),
        "fc1_w": u(ks[4], (FC1_DIM, H), k_fc1),           # (128, 100)
        "fc1_b": u(ks[5], (FC1_DIM,), k_fc1),
        "fc2_w": u(ks[6], (num_classes, FC1_DIM), k_fc2),
        "fc2_b": u(ks[7], (num_classes,), k_fc2),
    }


def prepare_params(params):
    """One-time conversion of PyTorch-layout weights into the fused, lane-padded kernel
    layout (call once, outside the forward path)."""
    H, HP = HIDDEN, HIDDEN_PAD
    C = params["w_ih"].shape[1]
    CP = ((C + 7) // 8) * 8                                           # sublane-pad channels

    # W_ih: (4H, C) -> per-gate (C, H) -> pad C->CP, H->HP -> gate-blocked lanes (CP, 4*HP)
    wih = params["w_ih"].reshape(4, H, C).transpose(0, 2, 1)          # (4, C, H)
    wih = jnp.pad(wih, ((0, 0), (0, CP - C), (0, HP - H)))            # (4, CP, HP)
    wih = wih.transpose(1, 0, 2).reshape(CP, 4 * HP)                  # (CP, 4*HP)

    # W_hh: (4H, H) -> per-gate (H_in, H_out) -> pad both -> (HP, 4*HP); bf16 for the MXU.
    whh = params["w_hh"].reshape(4, H, H).transpose(0, 2, 1)          # (4, Hin, Hout)
    whh = jnp.pad(whh, ((0, 0), (0, HP - H), (0, HP - H)))            # (4, HP, HP)
    whh = whh.transpose(1, 0, 2).reshape(HP, 4 * HP).astype(jnp.bfloat16)

    # Fused bias (b_ih + b_hh), gate-blocked and padded: (1, 4*HP)
    b = (params["b_ih"] + params["b_hh"]).reshape(4, H)
    b = jnp.pad(b, ((0, 0), (0, HP - H))).reshape(1, 4 * HP)

    w1 = jnp.pad(params["fc1_w"].T, ((0, HP - H), (0, 0)))            # (HP, 128)
    b1 = params["fc1_b"].reshape(1, FC1_DIM)
    w2 = params["fc2_w"].T                                            # (128, NC)
    b2 = params["fc2_b"].reshape(1, -1)
    return {"wih": wih, "whh": whh, "b": b, "w1": w1, "b1": b1, "w2": w2, "b2": b2}


def _pick_t_tile(T, target=8):
    t = min(target, T)
    while T % t:
        t -= 1
    return t


# ------------------------------ full forward -----------------------------------
@jax.jit
def lstm_model_forward(x_bct, prep):
    """x_bct: (B, C, T) — same layout as the PyTorch module's input."""
    B, C, T = x_bct.shape
    CP, G = prep["wih"].shape                 # padded channels, 4*HP
    HP = prep["whh"].shape[0]
    NC = prep["w2"].shape[-1]

    BP = ((B + BATCH_TILE - 1) // BATCH_TILE) * BATCH_TILE
    NB = BP // BATCH_TILE
    TT = _pick_t_tile(T)
    NT = T // TT

    # (B,C,T) -> time-major (T,B,C), pad batch->BP rows / channels->CP lanes, then group
    # into per-batch-tile 2-D slabs: (NB, T*8, CP).  Tiny array; XLA fuses these copies.
    x = jnp.transpose(x_bct, (2, 0, 1)).astype(jnp.float32)           # (T, B, C)
    x = jnp.pad(x, ((0, 0), (0, BP - B), (0, CP - C)))                # (T, BP, CP)
    x = x.reshape(T, NB, BATCH_TILE, CP).transpose(1, 0, 2, 3)
    x = x.reshape(NB, T * BATCH_TILE, CP)

    const = lambda b, t: (0, 0)
    out = pl.pallas_call(
        _lstm_head_kernel,
        out_shape=jax.ShapeDtypeStruct((BP, NC), jnp.float32),
        grid_spec=pltpu.PrefetchScalarGridSpec(
            num_scalar_prefetch=0,
            grid=(NB, NT),
            in_specs=[
                pl.BlockSpec((pl.Squeezed(), TT * BATCH_TILE, CP),
                             lambda b, t: (b, t, 0)),                  # streamed x tile
                pl.BlockSpec((CP, G), const),                          # wih (resident)
                pl.BlockSpec((1, G), const),                           # fused bias
                pl.BlockSpec((HP, G), const),                          # whh (bf16, resident)
                pl.BlockSpec((HP, FC1_DIM), const),                    # fc1 W
                pl.BlockSpec((1, FC1_DIM), const),                     # fc1 b
                pl.BlockSpec((FC1_DIM, NC), const),                    # fc2 W
                pl.BlockSpec((1, NC), const),                          # fc2 b
            ],
            out_specs=pl.BlockSpec((BATCH_TILE, NC), lambda b, t: (b, 0)),
            scratch_shapes=[
                pltpu.VMEM((TT * BATCH_TILE, G), jnp.float32),   # per-tile input projection
                pltpu.VMEM((BATCH_TILE, HP), jnp.float32),       # h carried across t tiles
                pltpu.VMEM((BATCH_TILE, HP), jnp.float32),       # c carried across t tiles
            ],
        ),
        compiler_params=pltpu.CompilerParams(
            dimension_semantics=("parallel", "arbitrary"),
            vmem_limit_bytes=32 * 1024 * 1024,   # footprint is ~1 MiB; fits v7x's 64 MiB
        ),
    )(x, prep["wih"], prep["b"], prep["whh"], prep["w1"], prep["b1"],
      prep["w2"], prep["b2"])
    return out[:B]


# ------------------------------ pure-JAX reference -----------------------------
def reference_forward(x_bct, params):
    H = HIDDEN
    x = jnp.transpose(x_bct, (0, 2, 1)).astype(jnp.float32)  # (B, T, C)
    B = x.shape[0]

    def step(carry, xt):
        h, c = carry
        gates = xt @ params["w_ih"].T + params["b_ih"] + h @ params["w_hh"].T + params["b_hh"]
        i, f, g, o = jnp.split(gates, 4, axis=-1)
        i, f, g, o = jax.nn.sigmoid(i), jax.nn.sigmoid(f), jnp.tanh(g), jax.nn.sigmoid(o)
        c_new = f * c + i * g
        h_new = o * jnp.tanh(c_new)
        return (h_new, c_new), None

    h0 = jnp.zeros((B, H), jnp.float32)
    c0 = jnp.zeros((B, H), jnp.float32)
    (h_last, _), _ = jax.lax.scan(step, (h0, c0), jnp.transpose(x, (1, 0, 2)))
    z1 = jnp.maximum(h_last @ params["fc1_w"].T + params["fc1_b"], 0.0)
    return z1 @ params["fc2_w"].T + params["fc2_b"]


# ----------------------------------- main --------------------------------------
if __name__ == "__main__":
    B, C, T = 2, 4, 16
    NUM_CLASSES = 10

    key = jax.random.PRNGKey(0)
    kx, kp = jax.random.split(key)
    x = jax.random.normal(kx, (B, C, T), jnp.float32)   # PyTorch input layout (B, C, T)
    params = init_params(kp, C, NUM_CLASSES)

    prep = jax.block_until_ready(prepare_params(params))   # one-time kernel-layout weights

    out = jax.block_until_ready(lstm_model_forward(x, prep))
    ref = jax.block_until_ready(reference_forward(x, params))

    assert out.shape == (B, NUM_CLASSES), out.shape
    # Tolerance accounts for the bf16 recurrent-weight path (f32 accumulation).
    np.testing.assert_allclose(np.asarray(out), np.asarray(ref), rtol=2e-2, atol=2e-2)
    print("KERNEL_OK")
</pallas_src>

<mosaic_0001>
module attributes {stable_mosaic.version = 11 : i64} {
  func.func @_lstm_head_kernel(%arg0: i32, %arg1: i32, %arg2: memref<1x64x8xf32, #tpu.memory_space<vmem>>, %arg3: memref<8x512xf32, #tpu.memory_space<vmem>>, %arg4: memref<1x512xf32, #tpu.memory_space<vmem>>, %arg5: memref<128x512xbf16, #tpu.memory_space<vmem>>, %arg6: memref<128x128xf32, #tpu.memory_space<vmem>>, %arg7: memref<1x128xf32, #tpu.memory_space<vmem>>, %arg8: memref<128x10xf32, #tpu.memory_space<vmem>>, %arg9: memref<1x10xf32, #tpu.memory_space<vmem>>, %arg10: memref<8x10xf32, #tpu.memory_space<vmem>>, %arg11: memref<64x512xf32, #tpu.memory_space<vmem>>, %arg12: memref<8x128xf32, #tpu.memory_space<vmem>>, %arg13: memref<8x128xf32, #tpu.memory_space<vmem>>) attributes {dimension_semantics = [#tpu.dimension_semantics<parallel>, #tpu.dimension_semantics<arbitrary>], iteration_bounds = array<i64: 1, 2>, scalar_prefetch = 0 : i64, scratch_operands = 3 : i64, tpu.core_type = #tpu.core_type<tc>, window_params = [{transform_indices = @transform_0, window_bounds = array<i64: 1, 64, 8>}, {pipeline_mode = #tpu.pipeline_mode<synchronous>, transform_indices = @transform_1, window_bounds = array<i64: 8, 512>}, {pipeline_mode = #tpu.pipeline_mode<synchronous>, transform_indices = @transform_2, window_bounds = array<i64: 1, 512>}, {pipeline_mode = #tpu.pipeline_mode<synchronous>, transform_indices = @transform_3, window_bounds = array<i64: 128, 512>}, {pipeline_mode = #tpu.pipeline_mode<synchronous>, transform_indices = @transform_4, window_bounds = array<i64: 128, 128>}, {pipeline_mode = #tpu.pipeline_mode<synchronous>, transform_indices = @transform_5, window_bounds = array<i64: 1, 128>}, {pipeline_mode = #tpu.pipeline_mode<synchronous>, transform_indices = @transform_6, window_bounds = array<i64: 128, 10>}, {pipeline_mode = #tpu.pipeline_mode<synchronous>, transform_indices = @transform_7, window_bounds = array<i64: 1, 10>}, {transform_indices = @transform_8, window_bounds = array<i64: 8, 10>}]} {
    %c0_i32 = arith.constant 0 : i32
    %0 = arith.cmpi eq, %arg1, %c0_i32 : i32
    %1 = arith.extui %0 : i1 to i32
    %c0_i32_0 = arith.constant 0 : i32
    %2 = arith.cmpi ne, %1, %c0_i32_0 : i32
    scf.if %2 {
      %cst_61 = arith.constant 0.000000e+00 : f32
      %251 = vector.broadcast %cst_61 : f32 to vector<8x128xf32>
      %c0_62 = arith.constant 0 : index
      %c0_63 = arith.constant 0 : index
      %252 = vector.load %arg12[%c0_62, %c0_63] : memref<8x128xf32, #tpu.memory_space<vmem>>, vector<8x128xf32>
      tpu.vector_store %arg12[%c0_62, %c0_63], %251 {strides = array<i32>} : memref<8x128xf32, #tpu.memory_space<vmem>>, vector<8x128xf32>,
      %cst_64 = arith.constant 0.000000e+00 : f32
      %253 = vector.broadcast %cst_64 : f32 to vector<8x128xf32>
      %c0_65 = arith.constant 0 : index
      %c0_66 = arith.constant 0 : index
      %254 = vector.load %arg13[%c0_65, %c0_66] : memref<8x128xf32, #tpu.memory_space<vmem>>, vector<8x128xf32>
      tpu.vector_store %arg13[%c0_65, %c0_66], %253 {strides = array<i32>} : memref<8x128xf32, #tpu.memory_space<vmem>>, vector<8x128xf32>,
    } else {
    }
    %c0 = arith.constant 0 : index
    %c0_1 = arith.constant 0 : index
    %c0_2 = arith.constant 0 : index
    %3 = vector.load %arg2[%c0, %c0_1, %c0_2] : memref<1x64x8xf32, #tpu.memory_space<vmem>>, vector<1x64x8xf32>
    %4 = vector.shape_cast %3 : vector<1x64x8xf32> to vector<64x8xf32>
    %c0_3 = arith.constant 0 : index
    %c0_4 = arith.constant 0 : index
    %5 = vector.load %arg3[%c0_3, %c0_4] : memref<8x512xf32, #tpu.memory_space<vmem>>, vector<8x512xf32>
    %cst = arith.constant dense<0.000000e+00> : vector<64x512xf32>
    %6 = tpu.matmul %4, %5, %cst {dimension_numbers = #tpu.dot_dimension_numbers<[1], [0], [0], [1], [0, 0, 1, 1], [], []>} : vector<64x8xf32>, vector<8x512xf32>, vector<64x512xf32> -> vector<64x512xf32>
    %c0_5 = arith.constant 0 : index
    %c0_6 = arith.constant 0 : index
    %7 = vector.load %arg4[%c0_5, %c0_6] : memref<1x512xf32, #tpu.memory_space<vmem>>, vector<1x512xf32>
    %8 = vector.broadcast %7 : vector<1x512xf32> to vector<64x512xf32>
    %9 = arith.addf %6, %8 : vector<64x512xf32>
    %c0_7 = arith.constant 0 : index
    %c0_8 = arith.constant 0 : index
    %10 = vector.load %arg11[%c0_7, %c0_8] : memref<64x512xf32, #tpu.memory_space<vmem>>, vector<64x512xf32>
    tpu.vector_store %arg11[%c0_7, %c0_8], %9 {strides = array<i32>} : memref<64x512xf32, #tpu.memory_space<vmem>>, vector<64x512xf32>,
    %c0_9 = arith.constant 0 : index
    %c0_10 = arith.constant 0 : index
    %11 = vector.load %arg5[%c0_9, %c0_10] : memref<128x512xbf16, #tpu.memory_space<vmem>>, vector<128x512xbf16>
    %c0_11 = arith.constant 0 : index
    %c0_12 = arith.constant 0 : index
    %12 = vector.load %arg12[%c0_11, %c0_12] : memref<8x128xf32, #tpu.memory_space<vmem>>, vector<8x128xf32>
    %c0_13 = arith.constant 0 : index
    %c0_14 = arith.constant 0 : index
    %13 = vector.load %arg13[%c0_13, %c0_14] : memref<8x128xf32, #tpu.memory_space<vmem>>, vector<8x128xf32>
    %c0_15 = arith.constant 0 : index
    %c0_16 = arith.constant 0 : index
    %14 = vector.load %arg11[%c0_15, %c0_16] : memref<64x512xf32, #tpu.memory_space<vmem>>, vector<8x512xf32>
    %15 = arith.truncf %12 : vector<8x128xf32> to vector<8x128xbf16>
    %cst_17 = arith.constant dense<0.000000e+00> : vector<8x512xf32>
    %16 = tpu.matmul %15, %11, %cst_17 {dimension_numbers = #tpu.dot_dimension_numbers<[1], [0], [0], [1], [0, 0, 1, 1], [], []>} : vector<8x128xbf16>, vector<128x512xbf16>, vector<8x512xf32> -> vector<8x512xf32>
    %17 = arith.addf %14, %16 : vector<8x512xf32>
    %18 = vector.extract_strided_slice %17 {offsets = [0, 0], sizes = [8, 128], strides = [1, 1]} : vector<8x512xf32> to vector<8x128xf32>
    %19 = arith.negf %18 : vector<8x128xf32>
    %20 = math.exp %19 : vector<8x128xf32>
    %cst_18 = arith.constant 1.000000e+00 : f32
    %21 = vector.broadcast %cst_18 : f32 to vector<8x128xf32>
    %22 = arith.addf %21, %20 : vector<8x128xf32>
    %23 = arith.divf %21, %22 : vector<8x128xf32>
    %24 = vector.extract_strided_slice %17 {offsets = [0, 128], sizes = [8, 128], strides = [1, 1]} : vector<8x512xf32> to vector<8x128xf32>
    %25 = arith.negf %24 : vector<8x128xf32>
    %26 = math.exp %25 : vector<8x128xf32>
    %cst_19 = arith.constant 1.000000e+00 : f32
    %27 = vector.broadcast %cst_19 : f32 to vector<8x128xf32>
    %28 = arith.addf %27, %26 : vector<8x128xf32>
    %29 = arith.divf %27, %28 : vector<8x128xf32>
    %30 = vector.extract_strided_slice %17 {offsets = [0, 256], sizes = [8, 128], strides = [1, 1]} : vector<8x512xf32> to vector<8x128xf32>
    %31 = math.tanh %30 : vector<8x128xf32>
    %32 = vector.extract_strided_slice %17 {offsets = [0, 384], sizes = [8, 128], strides = [1, 1]} : vector<8x512xf32> to vector<8x128xf32>
    %33 = arith.negf %32 : vector<8x128xf32>
    %34 = math.exp %33 : vector<8x128xf32>
    %cst_20 = arith.constant 1.000000e+00 : f32
    %35 = vector.broadcast %cst_20 : f32 to vector<8x128xf32>
    %36 = arith.addf %35, %34 : vector<8x128xf32>
    %37 = arith.divf %35, %36 : vector<8x128xf32>
    %38 = arith.mulf %29, %13 : vector<8x128xf32>
    %39 = arith.mulf %23, %31 : vector<8x128xf32>
    %40 = arith.addf %38, %39 : vector<8x128xf32>
    %41 = math.tanh %40 : vector<8x128xf32>
    %42 = arith.mulf %37, %41 : vector<8x128xf32>
    %c8 = arith.constant 8 : index
    %c0_21 = arith.constant 0 : index
    %43 = vector.load %arg11[%c8, %c0_21] : memref<64x512xf32, #tpu.memory_space<vmem>>, vector<8x512xf32>
    %44 = arith.truncf %42 : vector<8x128xf32> to vector<8x128xbf16>
    %cst_22 = arith.constant dense<0.000000e+00> : vector<8x512xf32>
    %45 = tpu.matmul %44, %11, %cst_22 {dimension_numbers = #tpu.dot_dimension_numbers<[1], [0], [0], [1], [0, 0, 1, 1], [], []>} : vector<8x128xbf16>, vector<128x512xbf16>, vector<8x512xf32> -> vector<8x512xf32>
    %46 = arith.addf %43, %45 : vector<8x512xf32>
    %47 = vector.extract_strided_slice %46 {offsets = [0, 0], sizes = [8, 128], strides = [1, 1]} : vector<8x512xf32> to vector<8x128xf32>
    %48 = arith.negf %47 : vector<8x128xf32>
    %49 = math.exp %48 : vector<8x128xf32>
    %cst_23 = arith.constant 1.000000e+00 : f32
    %50 = vector.broadcast %cst_23 : f32 to vector<8x128xf32>
    %51 = arith.addf %50, %49 : vector<8x128xf32>
    %52 = arith.divf %50, %51 : vector<8x128xf32>
    %53 = vector.extract_strided_slice %46 {offsets = [0, 128], sizes = [8, 128], strides = [1, 1]} : vector<8x512xf32> to vector<8x128xf32>
    %54 = arith.negf %53 : vector<8x128xf32>
    %55 = math.exp %54 : vector<8x128xf32>
    %cst_24 = arith.constant 1.000000e+00 : f32
    %56 = vector.broadcast %cst_24 : f32 to vector<8x128xf32>
    %57 = arith.addf %56, %55 : vector<8x128xf32>
    %58 = arith.divf %56, %57 : vector<8x128xf32>
    %59 = vector.extract_strided_slice %46 {offsets = [0, 256], sizes = [8, 128], strides = [1, 1]} : vector<8x512xf32> to vector<8x128xf32>
    %60 = math.tanh %59 : vector<8x128xf32>
    %61 = vector.extract_strided_slice %46 {offsets = [0, 384], sizes = [8, 128], strides = [1, 1]} : vector<8x512xf32> to vector<8x128xf32>
    %62 = arith.negf %61 : vector<8x128xf32>
    %63 = math.exp %62 : vector<8x128xf32>
    %cst_25 = arith.constant 1.000000e+00 : f32
    %64 = vector.broadcast %cst_25 : f32 to vector<8x128xf32>
    %65 = arith.addf %64, %63 : vector<8x128xf32>
    %66 = arith.divf %64, %65 : vector<8x128xf32>
    %67 = arith.mulf %58, %40 : vector<8x128xf32>
    %68 = arith.mulf %52, %60 : vector<8x128xf32>
    %69 = arith.addf %67, %68 : vector<8x128xf32>
    %70 = math.tanh %69 : vector<8x128xf32>
    %71 = arith.mulf %66, %70 : vector<8x128xf32>
    %c16 = arith.constant 16 : index
    %c0_26 = arith.constant 0 : index
    %72 = vector.load %arg11[%c16, %c0_26] : memref<64x512xf32, #tpu.memory_space<vmem>>, vector<8x512xf32>
    %73 = arith.truncf %71 : vector<8x128xf32> to vector<8x128xbf16>
    %cst_27 = arith.constant dense<0.000000e+00> : vector<8x512xf32>
    %74 = tpu.matmul %73, %11, %cst_27 {dimension_numbers = #tpu.dot_dimension_numbers<[1], [0], [0], [1], [0, 0, 1, 1], [], []>} : vector<8x128xbf16>, vector<128x512xbf16>, vector<8x512xf32> -> vector<8x512xf32>
    %75 = arith.addf %72, %74 : vector<8x512xf32>
    %76 = vector.extract_strided_slice %75 {offsets = [0, 0], sizes = [8, 128], strides = [1, 1]} : vector<8x512xf32> to vector<8x128xf32>
    %77 = arith.negf %76 : vector<8x128xf32>
    %78 = math.exp %77 : vector<8x128xf32>
    %cst_28 = arith.constant 1.000000e+00 : f32
    %79 = vector.broadcast %cst_28 : f32 to vector<8x128xf32>
    %80 = arith.addf %79, %78 : vector<8x128xf32>
    %81 = arith.divf %79, %80 : vector<8x128xf32>
    %82 = vector.extract_strided_slice %75 {offsets = [0, 128], sizes = [8, 128], strides = [1, 1]} : vector<8x512xf32> to vector<8x128xf32>
    %83 = arith.negf %82 : vector<8x128xf32>
    %84 = math.exp %83 : vector<8x128xf32>
    %cst_29 = arith.constant 1.000000e+00 : f32
    %85 = vector.broadcast %cst_29 : f32 to vector<8x128xf32>
    %86 = arith.addf %85, %84 : vector<8x128xf32>
    %87 = arith.divf %85, %86 : vector<8x128xf32>
    %88 = vector.extract_strided_slice %75 {offsets = [0, 256], sizes = [8, 128], strides = [1, 1]} : vector<8x512xf32> to vector<8x128xf32>
    %89 = math.tanh %88 : vector<8x128xf32>
    %90 = vector.extract_strided_slice %75 {offsets = [0, 384], sizes = [8, 128], strides = [1, 1]} : vector<8x512xf32> to vector<8x128xf32>
    %91 = arith.negf %90 : vector<8x128xf32>
    %92 = math.exp %91 : vector<8x128xf32>
    %cst_30 = arith.constant 1.000000e+00 : f32
    %93 = vector.broadcast %cst_30 : f32 to vector<8x128xf32>
    %94 = arith.addf %93, %92 : vector<8x128xf32>
    %95 = arith.divf %93, %94 : vector<8x128xf32>
    %96 = arith.mulf %87, %69 : vector<8x128xf32>
    %97 = arith.mulf %81, %89 : vector<8x128xf32>
    %98 = arith.addf %96, %97 : vector<8x128xf32>
    %99 = math.tanh %98 : vector<8x128xf32>
    %100 = arith.mulf %95, %99 : vector<8x128xf32>
    %c24 = arith.constant 24 : index
    %c0_31 = arith.constant 0 : index
    %101 = vector.load %arg11[%c24, %c0_31] : memref<64x512xf32, #tpu.memory_space<vmem>>, vector<8x512xf32>
    %102 = arith.truncf %100 : vector<8x128xf32> to vector<8x128xbf16>
    %cst_32 = arith.constant dense<0.000000e+00> : vector<8x512xf32>
    %103 = tpu.matmul %102, %11, %cst_32 {dimension_numbers = #tpu.dot_dimension_numbers<[1], [0], [0], [1], [0, 0, 1, 1], [], []>} : vector<8x128xbf16>, vector<128x512xbf16>, vector<8x512xf32> -> vector<8x512xf32>
    %104 = arith.addf %101, %103 : vector<8x512xf32>
    %105 = vector.extract_strided_slice %104 {offsets = [0, 0], sizes = [8, 128], strides = [1, 1]} : vector<8x512xf32> to vector<8x128xf32>
    %106 = arith.negf %105 : vector<8x128xf32>
    %107 = math.exp %106 : vector<8x128xf32>
    %cst_33 = arith.constant 1.000000e+00 : f32
    %108 = vector.broadcast %cst_33 : f32 to vector<8x128xf32>
    %109 = arith.addf %108, %107 : vector<8x128xf32>
    %110 = arith.divf %108, %109 : vector<8x128xf32>
    %111 = vector.extract_strided_slice %104 {offsets = [0, 128], sizes = [8, 128], strides = [1, 1]} : vector<8x512xf32> to vector<8x128xf32>
    %112 = arith.negf %111 : vector<8x128xf32>
    %113 = math.exp %112 : vector<8x128xf32>
    %cst_34 = arith.constant 1.000000e+00 : f32
    %114 = vector.broadcast %cst_34 : f32 to vector<8x128xf32>
    %115 = arith.addf %114, %113 : vector<8x128xf32>
    %116 = arith.divf %114, %115 : vector<8x128xf32>
    %117 = vector.extract_strided_slice %104 {offsets = [0, 256], sizes = [8, 128], strides = [1, 1]} : vector<8x512xf32> to vector<8x128xf32>
    %118 = math.tanh %117 : vector<8x128xf32>
    %119 = vector.extract_strided_slice %104 {offsets = [0, 384], sizes = [8, 128], strides = [1, 1]} : vector<8x512xf32> to vector<8x128xf32>
    %120 = arith.negf %119 : vector<8x128xf32>
    %121 = math.exp %120 : vector<8x128xf32>
    %cst_35 = arith.constant 1.000000e+00 : f32
    %122 = vector.broadcast %cst_35 : f32 to vector<8x128xf32>
    %123 = arith.addf %122, %121 : vector<8x128xf32>
    %124 = arith.divf %122, %123 : vector<8x128xf32>
    %125 = arith.mulf %116, %98 : vector<8x128xf32>
    %126 = arith.mulf %110, %118 : vector<8x128xf32>
    %127 = arith.addf %125, %126 : vector<8x128xf32>
    %128 = math.tanh %127 : vector<8x128xf32>
    %129 = arith.mulf %124, %128 : vector<8x128xf32>
    %c32 = arith.constant 32 : index
    %c0_36 = arith.constant 0 : index
    %130 = vector.load %arg11[%c32, %c0_36] : memref<64x512xf32, #tpu.memory_space<vmem>>, vector<8x512xf32>
    %131 = arith.truncf %129 : vector<8x128xf32> to vector<8x128xbf16>
    %cst_37 = arith.constant dense<0.000000e+00> : vector<8x512xf32>
    %132 = tpu.matmul %131, %11, %cst_37 {dimension_numbers = #tpu.dot_dimension_numbers<[1], [0], [0], [1], [0, 0, 1, 1], [], []>} : vector<8x128xbf16>, vector<128x512xbf16>, vector<8x512xf32> -> vector<8x512xf32>
    %133 = arith.addf %130, %132 : vector<8x512xf32>
    %134 = vector.extract_strided_slice %133 {offsets = [0, 0], sizes = [8, 128], strides = [1, 1]} : vector<8x512xf32> to vector<8x128xf32>
    %135 = arith.negf %134 : vector<8x128xf32>
    %136 = math.exp %135 : vector<8x128xf32>
    %cst_38 = arith.constant 1.000000e+00 : f32
    %137 = vector.broadcast %cst_38 : f32 to vector<8x128xf32>
    %138 = arith.addf %137, %136 : vector<8x128xf32>
    %139 = arith.divf %137, %138 : vector<8x128xf32>
    %140 = vector.extract_strided_slice %133 {offsets = [0, 128], sizes = [8, 128], strides = [1, 1]} : vector<8x512xf32> to vector<8x128xf32>
    %141 = arith.negf %140 : vector<8x128xf32>
    %142 = math.exp %141 : vector<8x128xf32>
    %cst_39 = arith.constant 1.000000e+00 : f32
    %143 = vector.broadcast %cst_39 : f32 to vector<8x128xf32>
    %144 = arith.addf %143, %142 : vector<8x128xf32>
    %145 = arith.divf %143, %144 : vector<8x128xf32>
    %146 = vector.extract_strided_slice %133 {offsets = [0, 256], sizes = [8, 128], strides = [1, 1]} : vector<8x512xf32> to vector<8x128xf32>
    %147 = math.tanh %146 : vector<8x128xf32>
    %148 = vector.extract_strided_slice %133 {offsets = [0, 384], sizes = [8, 128], strides = [1, 1]} : vector<8x512xf32> to vector<8x128xf32>
    %149 = arith.negf %148 : vector<8x128xf32>
    %150 = math.exp %149 : vector<8x128xf32>
    %cst_40 = arith.constant 1.000000e+00 : f32
    %151 = vector.broadcast %cst_40 : f32 to vector<8x128xf32>
    %152 = arith.addf %151, %150 : vector<8x128xf32>
    %153 = arith.divf %151, %152 : vector<8x128xf32>
    %154 = arith.mulf %145, %127 : vector<8x128xf32>
    %155 = arith.mulf %139, %147 : vector<8x128xf32>
    %156 = arith.addf %154, %155 : vector<8x128xf32>
    %157 = math.tanh %156 : vector<8x128xf32>
    %158 = arith.mulf %153, %157 : vector<8x128xf32>
    %c40 = arith.constant 40 : index
    %c0_41 = arith.constant 0 : index
    %159 = vector.load %arg11[%c40, %c0_41] : memref<64x512xf32, #tpu.memory_space<vmem>>, vector<8x512xf32>
    %160 = arith.truncf %158 : vector<8x128xf32> to vector<8x128xbf16>
    %cst_42 = arith.constant dense<0.000000e+00> : vector<8x512xf32>
    %161 = tpu.matmul %160, %11, %cst_42 {dimension_numbers = #tpu.dot_dimension_numbers<[1], [0], [0], [1], [0, 0, 1, 1], [], []>} : vector<8x128xbf16>, vector<128x512xbf16>, vector<8x512xf32> -> vector<8x512xf32>
    %162 = arith.addf %159, %161 : vector<8x512xf32>
    %163 = vector.extract_strided_slice %162 {offsets = [0, 0], sizes = [8, 128], strides = [1, 1]} : vector<8x512xf32> to vector<8x128xf32>
    %164 = arith.negf %163 : vector<8x128xf32>
    %165 = math.exp %164 : vector<8x128xf32>
    %cst_43 = arith.constant 1.000000e+00 : f32
    %166 = vector.broadcast %cst_43 : f32 to vector<8x128xf32>
    %167 = arith.addf %166, %165 : vector<8x128xf32>
    %168 = arith.divf %166, %167 : vector<8x128xf32>
    %169 = vector.extract_strided_slice %162 {offsets = [0, 128], sizes = [8, 128], strides = [1, 1]} : vector<8x512xf32> to vector<8x128xf32>
    %170 = arith.negf %169 : vector<8x128xf32>
    %171 = math.exp %170 : vector<8x128xf32>
    %cst_44 = arith.constant 1.000000e+00 : f32
    %172 = vector.broadcast %cst_44 : f32 to vector<8x128xf32>
    %173 = arith.addf %172, %171 : vector<8x128xf32>
    %174 = arith.divf %172, %173 : vector<8x128xf32>
    %175 = vector.extract_strided_slice %162 {offsets = [0, 256], sizes = [8, 128], strides = [1, 1]} : vector<8x512xf32> to vector<8x128xf32>
    %176 = math.tanh %175 : vector<8x128xf32>
    %177 = vector.extract_strided_slice %162 {offsets = [0, 384], sizes = [8, 128], strides = [1, 1]} : vector<8x512xf32> to vector<8x128xf32>
    %178 = arith.negf %177 : vector<8x128xf32>
    %179 = math.exp %178 : vector<8x128xf32>
    %cst_45 = arith.constant 1.000000e+00 : f32
    %180 = vector.broadcast %cst_45 : f32 to vector<8x128xf32>
    %181 = arith.addf %180, %179 : vector<8x128xf32>
    %182 = arith.divf %180, %181 : vector<8x128xf32>
    %183 = arith.mulf %174, %156 : vector<8x128xf32>
    %184 = arith.mulf %168, %176 : vector<8x128xf32>
    %185 = arith.addf %183, %184 : vector<8x128xf32>
    %186 = math.tanh %185 : vector<8x128xf32>
    %187 = arith.mulf %182, %186 : vector<8x128xf32>
    %c48 = arith.constant 48 : index
    %c0_46 = arith.constant 0 : index
    %188 = vector.load %arg11[%c48, %c0_46] : memref<64x512xf32, #tpu.memory_space<vmem>>, vector<8x512xf32>
    %189 = arith.truncf %187 : vector<8x128xf32> to vector<8x128xbf16>
    %cst_47 = arith.constant dense<0.000000e+00> : vector<8x512xf32>
    %190 = tpu.matmul %189, %11, %cst_47 {dimension_numbers = #tpu.dot_dimension_numbers<[1], [0], [0], [1], [0, 0, 1, 1], [], []>} : vector<8x128xbf16>, vector<128x512xbf16>, vector<8x512xf32> -> vector<8x512xf32>
    %191 = arith.addf %188, %190 : vector<8x512xf32>
    %192 = vector.extract_strided_slice %191 {offsets = [0, 0], sizes = [8, 128], strides = [1, 1]} : vector<8x512xf32> to vector<8x128xf32>
    %193 = arith.negf %192 : vector<8x128xf32>
    %194 = math.exp %193 : vector<8x128xf32>
    %cst_48 = arith.constant 1.000000e+00 : f32
    %195 = vector.broadcast %cst_48 : f32 to vector<8x128xf32>
    %196 = arith.addf %195, %194 : vector<8x128xf32>
    %197 = arith.divf %195, %196 : vector<8x128xf32>
    %198 = vector.extract_strided_slice %191 {offsets = [0, 128], sizes = [8, 128], strides = [1, 1]} : vector<8x512xf32> to vector<8x128xf32>
    %199 = arith.negf %198 : vector<8x128xf32>
    %200 = math.exp %199 : vector<8x128xf32>
    %cst_49 = arith.constant 1.000000e+00 : f32
    %201 = vector.broadcast %cst_49 : f32 to vector<8x128xf32>
    %202 = arith.addf %201, %200 : vector<8x128xf32>
    %203 = arith.divf %201, %202 : vector<8x128xf32>
    %204 = vector.extract_strided_slice %191 {offsets = [0, 256], sizes = [8, 128], strides = [1, 1]} : vector<8x512xf32> to vector<8x128xf32>
    %205 = math.tanh %204 : vector<8x128xf32>
    %206 = vector.extract_strided_slice %191 {offsets = [0, 384], sizes = [8, 128], strides = [1, 1]} : vector<8x512xf32> to vector<8x128xf32>
    %207 = arith.negf %206 : vector<8x128xf32>
    %208 = math.exp %207 : vector<8x128xf32>
    %cst_50 = arith.constant 1.000000e+00 : f32
    %209 = vector.broadcast %cst_50 : f32 to vector<8x128xf32>
    %210 = arith.addf %209, %208 : vector<8x128xf32>
    %211 = arith.divf %209, %210 : vector<8x128xf32>
    %212 = arith.mulf %203, %185 : vector<8x128xf32>
    %213 = arith.mulf %197, %205 : vector<8x128xf32>
    %214 = arith.addf %212, %213 : vector<8x128xf32>
    %215 = math.tanh %214 : vector<8x128xf32>
    %216 = arith.mulf %211, %215 : vector<8x128xf32>
    %c56 = arith.constant 56 : index
    %c0_51 = arith.constant 0 : index
    %217 = vector.load %arg11[%c56, %c0_51] : memref<64x512xf32, #tpu.memory_space<vmem>>, vector<8x512xf32>
    %218 = arith.truncf %216 : vector<8x128xf32> to vector<8x128xbf16>
    %cst_52 = arith.constant dense<0.000000e+00> : vector<8x512xf32>
    %219 = tpu.matmul %218, %11, %cst_52 {dimension_numbers = #tpu.dot_dimension_numbers<[1], [0], [0], [1], [0, 0, 1, 1], [], []>} : vector<8x128xbf16>, vector<128x512xbf16>, vector<8x512xf32> -> vector<8x512xf32>
    %220 = arith.addf %217, %219 : vector<8x512xf32>
    %221 = vector.extract_strided_slice %220 {offsets = [0, 0], sizes = [8, 128], strides = [1, 1]} : vector<8x512xf32> to vector<8x128xf32>
    %222 = arith.negf %221 : vector<8x128xf32>
    %223 = math.exp %222 : vector<8x128xf32>
    %cst_53 = arith.constant 1.000000e+00 : f32
    %224 = vector.broadcast %cst_53 : f32 to vector<8x128xf32>
    %225 = arith.addf %224, %223 : vector<8x128xf32>
    %226 = arith.divf %224, %225 : vector<8x128xf32>
    %227 = vector.extract_strided_slice %220 {offsets = [0, 128], sizes = [8, 128], strides = [1, 1]} : vector<8x512xf32> to vector<8x128xf32>
    %228 = arith.negf %227 : vector<8x128xf32>
    %229 = math.exp %228 : vector<8x128xf32>
    %cst_54 = arith.constant 1.000000e+00 : f32
    %230 = vector.broadcast %cst_54 : f32 to vector<8x128xf32>
    %231 = arith.addf %230, %229 : vector<8x128xf32>
    %232 = arith.divf %230, %231 : vector<8x128xf32>
    %233 = vector.extract_strided_slice %220 {offsets = [0, 256], sizes = [8, 128], strides = [1, 1]} : vector<8x512xf32> to vector<8x128xf32>
    %234 = math.tanh %233 : vector<8x128xf32>
    %235 = vector.extract_strided_slice %220 {offsets = [0, 384], sizes = [8, 128], strides = [1, 1]} : vector<8x512xf32> to vector<8x128xf32>
    %236 = arith.negf %235 : vector<8x128xf32>
    %237 = math.exp %236 : vector<8x128xf32>
    %cst_55 = arith.constant 1.000000e+00 : f32
    %238 = vector.broadcast %cst_55 : f32 to vector<8x128xf32>
    %239 = arith.addf %238, %237 : vector<8x128xf32>
    %240 = arith.divf %238, %239 : vector<8x128xf32>
    %241 = arith.mulf %232, %214 : vector<8x128xf32>
    %242 = arith.mulf %226, %234 : vector<8x128xf32>
    %243 = arith.addf %241, %242 : vector<8x128xf32>
    %244 = math.tanh %243 : vector<8x128xf32>
    %245 = arith.mulf %240, %244 : vector<8x128xf32>
    %c0_56 = arith.constant 0 : index
    %c0_57 = arith.constant 0 : index
    %246 = vector.load %arg12[%c0_56, %c0_57] : memref<8x128xf32, #tpu.memory_space<vmem>>, vector<8x128xf32>
    tpu.vector_store %arg12[%c0_56, %c0_57], %245 {strides = array<i32>} : memref<8x128xf32, #tpu.memory_space<vmem>>, vector<8x128xf32>,
    %c0_58 = arith.constant 0 : index
    %c0_59 = arith.constant 0 : index
    %247 = vector.load %arg13[%c0_58, %c0_59] : memref<8x128xf32, #tpu.memory_space<vmem>>, vector<8x128xf32>
    tpu.vector_store %arg13[%c0_58, %c0_59], %243 {strides = array<i32>} : memref<8x128xf32, #tpu.memory_space<vmem>>, vector<8x128xf32>,
    %c1_i32 = arith.constant 1 : i32
    %248 = arith.cmpi eq, %arg1, %c1_i32 : i32
    %249 = arith.extui %248 : i1 to i32
    %c0_i32_60 = arith.constant 0 : i32
    %250 = arith.cmpi ne, %249, %c0_i32_60 : i32
    scf.if %250 {
      %c0_61 = arith.constant 0 : index
      %c0_62 = arith.constant 0 : index
      %251 = vector.load %arg6[%c0_61, %c0_62] : memref<128x128xf32, #tpu.memory_space<vmem>>, vector<128x128xf32>
      %cst_63 = arith.constant dense<0.000000e+00> : vector<8x128xf32>
      %252 = tpu.matmul %245, %251, %cst_63 {dimension_numbers = #tpu.dot_dimension_numbers<[1], [0], [0], [1], [0, 0, 1, 1], [], []>} : vector<8x128xf32>, vector<128x128xf32>, vector<8x128xf32> -> vector<8x128xf32>
      %c0_64 = arith.constant 0 : index
      %c0_65 = arith.constant 0 : index
      %253 = vector.load %arg7[%c0_64, %c0_65] : memref<1x128xf32, #tpu.memory_space<vmem>>, vector<1x128xf32>
      %254 = vector.broadcast %253 : vector<1x128xf32> to vector<8x128xf32>
      %255 = arith.addf %252, %254 : vector<8x128xf32>
      %cst_66 = arith.constant 0.000000e+00 : f32
      %256 = vector.broadcast %cst_66 : f32 to vector<8x128xf32>
      %257 = arith.maximumf %255, %256 : vector<8x128xf32>
      %c0_67 = arith.constant 0 : index
      %c0_68 = arith.constant 0 : index
      %258 = vector.load %arg8[%c0_67, %c0_68] : memref<128x10xf32, #tpu.memory_space<vmem>>, vector<128x10xf32>
      %cst_69 = arith.constant dense<0.000000e+00> : vector<8x10xf32>
      %259 = tpu.matmul %257, %258, %cst_69 {dimension_numbers = #tpu.dot_dimension_numbers<[1], [0], [0], [1], [0, 0, 1, 1], [], []>} : vector<8x128xf32>, vector<128x10xf32>, vector<8x10xf32> -> vector<8x10xf32>
      %c0_70 = arith.constant 0 : index
      %c0_71 = arith.constant 0 : index
      %260 = vector.load %arg9[%c0_70, %c0_71] : memref<1x10xf32, #tpu.memory_space<vmem>>, vector<1x10xf32>
      %261 = vector.broadcast %260 : vector<1x10xf32> to vector<8x10xf32>
      %262 = arith.addf %259, %261 : vector<8x10xf32>
      %c0_72 = arith.constant 0 : index
      %c0_73 = arith.constant 0 : index
      %263 = vector.load %arg10[%c0_72, %c0_73] : memref<8x10xf32, #tpu.memory_space<vmem>>, vector<8x10xf32>
      tpu.vector_store %arg10[%c0_72, %c0_73], %262 {strides = array<i32>} : memref<8x10xf32, #tpu.memory_space<vmem>>, vector<8x10xf32>,
    } else {
    }
    return
  }
  func.func @transform_0(%arg0: i32, %arg1: i32) -> (i32, i32, i32) {
    %c0_i32 = arith.constant 0 : i32
    %c0_i32_0 = arith.constant 0 : i32
    return %arg0, %arg1, %c0_i32 : i32, i32, i32
  }
  func.func @transform_1(%arg0: i32, %arg1: i32) -> (i32, i32) {
    %c0_i32 = arith.constant 0 : i32
    %c0_i32_0 = arith.constant 0 : i32
    %c0_i32_1 = arith.constant 0 : i32
    return %c0_i32, %c0_i32_0 : i32, i32
  }
  func.func @transform_2(%arg0: i32, %arg1: i32) -> (i32, i32) {
    %c0_i32 = arith.constant 0 : i32
    %c0_i32_0 = arith.constant 0 : i32
    %c0_i32_1 = arith.constant 0 : i32
    return %c0_i32, %c0_i32_0 : i32, i32
  }
  func.func @transform_3(%arg0: i32, %arg1: i32) -> (i32, i32) {
    %c0_i32 = arith.constant 0 : i32
    %c0_i32_0 = arith.constant 0 : i32
    %c0_i32_1 = arith.constant 0 : i32
    return %c0_i32, %c0_i32_0 : i32, i32
  }
  func.func @transform_4(%arg0: i32, %arg1: i32) -> (i32, i32) {
    %c0_i32 = arith.constant 0 : i32
    %c0_i32_0 = arith.constant 0 : i32
    %c0_i32_1 = arith.constant 0 : i32
    return %c0_i32, %c0_i32_0 : i32, i32
  }
  func.func @transform_5(%arg0: i32, %arg1: i32) -> (i32, i32) {
    %c0_i32 = arith.constant 0 : i32
    %c0_i32_0 = arith.constant 0 : i32
    %c0_i32_1 = arith.constant 0 : i32
    return %c0_i32, %c0_i32_0 : i32, i32
  }
  func.func @transform_6(%arg0: i32, %arg1: i32) -> (i32, i32) {
    %c0_i32 = arith.constant 0 : i32
    %c0_i32_0 = arith.constant 0 : i32
    %c0_i32_1 = arith.constant 0 : i32
    return %c0_i32, %c0_i32_0 : i32, i32
  }
  func.func @transform_7(%arg0: i32, %arg1: i32) -> (i32, i32) {
    %c0_i32 = arith.constant 0 : i32
    %c0_i32_0 = arith.constant 0 : i32
    %c0_i32_1 = arith.constant 0 : i32
    return %c0_i32, %c0_i32_0 : i32, i32
  }
  func.func @transform_8(%arg0: i32, %arg1: i32) -> (i32, i32) {
    %c0_i32 = arith.constant 0 : i32
    %c0_i32_0 = arith.constant 0 : i32
    return %arg0, %c0_i32 : i32, i32
  }
}

</mosaic_0001>

<bundles_post_ra>
// kernel: lstm_model_forward.1
= control target key start
LH: loop header
LB: loop body
LE: loop exit
PB: predicated region body
PF: predicated region fallthrough
CT: control target
= control target key end

     0   :  { %13 = vsyncpa [#allocation6], 0  ;;  %s2454_s27 = smov 0   ;;  %s2456_s28 = smov 0   ;;  %s3247_s0 = inlined_call_operand.vmem [shape: f32[1,128,8], index: 0, kind: input, shape index: {}]   ;;  %s3248_s1 = inlined_call_operand.vmem [shape: f32[8,512], index: 1, kind: input, shape index: {}]   ;;  %s3249_s2 = inlined_call_operand.vmem [shape: f32[1,512], index: 2, kind: input, shape index: {}]   ;;  %s3250_s3 = inlined_call_operand.vmem [shape: bf16[128,512], index: 3, kind: input, shape index: {}]   ;;  %s3251_s4 = inlined_call_operand.hbm [shape: f32[128,128], index: 4, kind: input, shape index: {}]   ;;  %s3252_s5 = inlined_call_operand.vmem [shape: f32[1,128], index: 5, kind: input, shape index: {}]   ;;  %s3253_s6 = inlined_call_operand.vmem [shape: f32[128,10], index: 6, kind: input, shape index: {}]   ;;  %s3254_s7 = inlined_call_operand.vmem [shape: f32[1,10], index: 7, kind: input, shape index: {}]   ;;  %s3255_s8 = inlined_call_operand.vmem [shape: f32[8,10], index: 8, kind: output, shape index: {}]  }
   0x1   :  { %s2458_s29 = smov 0  }
   0x2 LB: > { %s1950_s30 = sadd.s32 4294967295, %s2403_s29   ;;  %s28_s9 = sadd.s32 1, %s2399_s28  ;;  %s2403_s29 = sphi %s2458_s29, %s19_s29   ;;  %s2399_s28 = sphi %s2456_s28, %s3301_s28   ;;  %s2395_s27 = sphi %s2454_s27, %s3300_s27  }
   0x3   : > { %p29_p0 = scmp.ge.s32.totalorder %s28_s9, 2  ;;  %p1951_p1 = scmp.ge.s32.totalorder %s2403_s29, 1 }
   0x4   : > { %p237_p2 = scmp.lt.s32.totalorder %s2403_s29, 3  ;;  %p2187_p4 = scmp.eq.s32.totalorder %s1950_s30, 0 }
   0x5   : > { %s3303_s9 = smov (%p29_p0, %s28_s9), 0  ;;  %s257_s12 = sshll.u32 %s3251_s4, 4  ;;  %s258_s12 = int_to_ptr.hbm [resolvable:$true] %s257_s12 }
   0x6   : > { %p238_p3 = pnand %p1951_p1, %p237_p2  ;;  %s2405_s13 = smov [#allocation5]  }
   0x7   : > { %s259_s14 = sshll.u32 %s2405_s13, 4  ;;  %s2406_s15 = smov 128   ;;  %s260_s14 = int_to_ptr.vmem [resolvable:$true] %s259_s14 }
   0x8   : > { %p2183_p5 = pneg %p238_p3  ;;  %s2407_s16 = smov 8  }
   0x9   : > { %297 = sbr.rel (%p238_p3) target bundleno = 1758 (0x6de), region = 52 }
   0xa   : > { %p2184_p6 = pnand %p2187_p4, %p2183_p5 }
   0xc   : > { %2186 = dma.hbm_to_vmem [thread:$0]  (!%p2184_p6), %s258_s12, 2048, %s260_s14, [#allocation6], %s2406_s15, %s2406_s15, %s2407_s16  }
   0xe   : > { %2390 = dma.done.wait (%p2187_p4), [#allocation6], 2048  }
   0xf   : > { %2392 = vsyncadd (%p2187_p4), [#allocation6], 4294965248  ;;  %s1956_s17 = sshll.u32 %s2395_s27, 3  ;;  %p1958_p8 = scmp.ne.s32.totalorder %s2395_s27, 0 }
  0x10   : > { %p338_p7 = scmp.lt.s32.totalorder %s1956_s17, 15 }
  0x11   : > { %352 = sbr.rel (%p1958_p8) target bundleno = 25 (0x19), region = 60 }
  0x12   : > { %s3305_s17 = smov (!%p338_p7, %s1956_s17), 15 }
  0x13   : > { %s1957_s18 = sshll.u32 %s3305_s17, 3 }
  0x14   : > { %s2482_s21 = scalar_lea.vmem %s3247_s0, %s1957_s18 }
  0x16   : > { %v2408_v0 = vmov 0.0  }
  0x17   : > { %353 = vst [vmem:[#allocation3] sm:$0xff] %v2408_v0 }
  0x18   : > { %354 = vst [vmem:[#allocation4] sm:$0xff] %v2408_v0 }
  0x19 PF: > { %v363_v1 = vld [vmem:[%s3248_s1] sm:$0xff]  ;;  %v364_v2 = vld [vmem:[%s3248_s1 + $0x8] sm:$0xff]  ;;  %v365_v3 = vld [vmem:[%s3248_s1 + $0x10] sm:$0xff]  ;;  %vm377_vm0 = vcmask 64512   ;;  %p2143_p9 = scmp.ne.s32.totalorder %s2395_s27, 1 }
  0x1a   : > { %417 = vmatpush.msra.mxu0 %v363_v1  ;;  %458 = vmatpush.msra.mxu1 %v364_v2  ;;  %v366_v4 = vld [vmem:[%s3248_s1 + $0x18] sm:$0xff]  ;;  %v355_v5 = vld [vmem:[%s2482_s21] sm:$0xff]  ;;  %v2177_v7 = vld [vmem:[%s3250_s3 + $0xec] sm:$0xf0] }
  0x1b   : > { %v2105_v6 = vld [vmem:[%s3250_s3 + $0xe0] sm:$0xf]  ;;  %499 = vmatpush.msra.mxu2 %v365_v3  ;;  %540 = vmatpush.msra.mxu3 %v366_v4  ;;  %v2175_v8 = vld [vmem:[%s3250_s3 + $0xe4] sm:$0xf]  ;;  %v2107_v9 = vld [vmem:[%s3250_s3 + $0xf0] sm:$0xf0] }
  0x1c   : > { %1959 = vmatmul.msk.f32.vlgmr.msra.gmra.mxu0 %vm377_vm0, %v355_v5  ;;  %1967 = vmatmul.msk.f32.vlgmr.msra.gmra.mxu1 %vm377_vm0, %v355_v5  ;;  %v2512_v10 = vor.u32 %v2177_v7, %v2105_v6  ;;  %v2514_v11 = vor.u32 %v2175_v8, %v2107_v9  ;;  %v2176_v12 = vld [vmem:[%s3250_s3 + $0xec] sm:$0xf]  ;;  %v2115_v13 = vld [vmem:[%s3250_s3 + $0xf8] sm:$0xf0]  ;;  %v2089_v15 = vld [vmem:[%s3250_s3 + $0xc0] sm:$0xf] }
  0x1d   : > { %1975 = vmatmul.msk.f32.vlgmr.msra.gmra.mxu2 %vm377_vm0, %v355_v5  ;;  %1983 = vmatmul.msk.f32.vlgmr.msra.gmra.mxu3 %vm377_vm0, %v355_v5  ;;  %v2524_v14 = vor.u32 %v2176_v12, %v2115_v13  ;;  %v2173_v16 = vld [vmem:[%s3250_s3 + $0xcc] sm:$0xf0]  ;;  %v2171_v17 = vld [vmem:[%s3250_s3 + $0xc4] sm:$0xf]  ;;  %v2091_v19 = vld [vmem:[%s3250_s3 + $0xd0] sm:$0xf0] }
  0x1e   : > { %797 = vmatpush.bf16.msrb.mxu0 %v2512_v10  ;;  %810 = vmatpush.bf16.msrb.mxu1 %v2514_v11  ;;  %v2537_v18 = vor.u32 %v2173_v16, %v2089_v15  ;;  %v2172_v20 = vld [vmem:[%s3250_s3 + $0xcc] sm:$0xf]  ;;  %v2099_v21 = vld [vmem:[%s3250_s3 + $0xd8] sm:$0xf0]  ;;  %v2550_v23 = vor.u32 %v2171_v17, %v2091_v19  ;;  %v2113_v25 = vld [vmem:[%s3250_s3 + $0xe8] sm:$0xf] }
  0x1f   : > { %836 = vmatpush.bf16.msrb.mxu3 %v2524_v14  ;;  %v356_v22 = vld [vmem:[%s2482_s21 + $0x8] sm:$0xff]  ;;  %v2552_v24 = vor.u32 %v2172_v20, %v2099_v21  ;;  %v2178_v26 = vld [vmem:[%s3250_s3 + $0xf4] sm:$0xf0]  ;;  %v2073_v28 = vld [vmem:[%s3250_s3 + $0xa0] sm:$0xf] }
  0x20   : > { %v2560_v27 = vor.u32 %v2178_v26, %v2113_v25  ;;  %v2169_v29 = vld [vmem:[%s3250_s3 + $0xac] sm:$0xf0]  ;;  %v2167_v30 = vld [vmem:[%s3250_s3 + $0xa4] sm:$0xf]  ;;  %v2075_v31 = vld [vmem:[%s3250_s3 + $0xb0] sm:$0xf0] }
  0x21   : > { %v2168_v32 = vld [vmem:[%s3250_s3 + $0xac] sm:$0xf]  ;;  %v2083_v33 = vld [vmem:[%s3250_s3 + $0xb8] sm:$0xf0]  ;;  %v2582_v34 = vor.u32 %v2169_v29, %v2073_v28  ;;  %v2584_v35 = vor.u32 %v2167_v30, %v2075_v31  ;;  %v2097_v36 = vld [vmem:[%s3250_s3 + $0xc8] sm:$0xf] }
  0x22   : > { %798 = vmatpush.bf16.msrb.mxu0 %v2537_v18  ;;  %811 = vmatpush.bf16.msrb.mxu1 %v2550_v23  ;;  %v2174_v37 = vld [vmem:[%s3250_s3 + $0xd4] sm:$0xf0]  ;;  %v2594_v38 = vor.u32 %v2168_v32, %v2083_v33  ;;  %v2057_v40 = vld [vmem:[%s3250_s3 + $0x80] sm:$0xf]  ;;  %v2165_v41 = vld [vmem:[%s3250_s3 + $0x8c] sm:$0xf0] }
  0x23   : > { %837 = vmatpush.bf16.msrb.mxu3 %v2552_v24  ;;  %823 = vmatpush.bf16.msrb.mxu2 %v2560_v27  ;;  %v2596_v39 = vor.u32 %v2174_v37, %v2097_v36  ;;  %v2163_v42 = vld [vmem:[%s3250_s3 + $0x84] sm:$0xf]  ;;  %v2059_v43 = vld [vmem:[%s3250_s3 + $0x90] sm:$0xf0]  ;;  %v2164_v44 = vld [vmem:[%s3250_s3 + $0x8c] sm:$0xf]  ;;  %v2628_v48 = vor.u32 %v2165_v41, %v2057_v40 }
  0x24   : > { %1960 = vmatmul.msk.f32.gmra.mxu0 %vm377_vm0, %v356_v22  ;;  %1968 = vmatmul.msk.f32.gmra.mxu1 %vm377_vm0, %v356_v22  ;;  %v2067_v45 = vld [vmem:[%s3250_s3 + $0x98] sm:$0xf0]  ;;  %v2081_v46 = vld [vmem:[%s3250_s3 + $0xa8] sm:$0xf]  ;;  %v2170_v47 = vld [vmem:[%s3250_s3 + $0xb4] sm:$0xf0]  ;;  %v2630_v49 = vor.u32 %v2163_v42, %v2059_v43 }
  0x25   : > { %1976 = vmatmul.msk.f32.gmra.mxu2 %vm377_vm0, %v356_v22  ;;  %1984 = vmatmul.msk.f32.gmra.mxu3 %vm377_vm0, %v356_v22  ;;  %v2041_v50 = vld [vmem:[%s3250_s3 + $0x60] sm:$0xf]  ;;  %v2161_v51 = vld [vmem:[%s3250_s3 + $0x6c] sm:$0xf0]  ;;  %v2640_v52 = vor.u32 %v2164_v44, %v2067_v45  ;;  %v2642_v53 = vor.u32 %v2170_v47, %v2081_v46  ;;  %v2159_v54 = vld [vmem:[%s3250_s3 + $0x64] sm:$0xf] }
  0x26   : > { %799 = vmatpush.bf16.msrb.mxu0 %v2582_v34  ;;  %812 = vmatpush.bf16.msrb.mxu1 %v2584_v35  ;;  %v2043_v55 = vld [vmem:[%s3250_s3 + $0x70] sm:$0xf0]  ;;  %v2160_v56 = vld [vmem:[%s3250_s3 + $0x6c] sm:$0xf]  ;;  %v2051_v57 = vld [vmem:[%s3250_s3 + $0x78] sm:$0xf0]  ;;  %v2665_v61 = vor.u32 %v2161_v51, %v2041_v50 }
  0x27   : > { %838 = vmatpush.bf16.msrb.mxu3 %v2594_v38  ;;  %824 = vmatpush.bf16.msrb.mxu2 %v2596_v39  ;;  %v2065_v58 = vld [vmem:[%s3250_s3 + $0x88] sm:$0xf]  ;;  %v2166_v59 = vld [vmem:[%s3250_s3 + $0x94] sm:$0xf0]  ;;  %v357_v60 = vld [vmem:[%s2482_s21 + $0x10] sm:$0xff]  ;;  %v2667_v62 = vor.u32 %v2159_v54, %v2043_v55  ;;  %v2677_v1 = vor.u32 %v2160_v56, %v2051_v57 }
  0x28   : > { %v2025_v63 = vld [vmem:[%s3250_s3 + $0x40] sm:$0xf]  ;;  %v2157_v0 = vld [vmem:[%s3250_s3 + $0x4c] sm:$0xf0]  ;;  %v2679_v2 = vor.u32 %v2166_v59, %v2065_v58  ;;  %v2155_v3 = vld [vmem:[%s3250_s3 + $0x44] sm:$0xf] }
  0x29   : > { %v2027_v4 = vld [vmem:[%s3250_s3 + $0x50] sm:$0xf0]  ;;  %v2156_v5 = vld [vmem:[%s3250_s3 + $0x4c] sm:$0xf]  ;;  %v2035_v6 = vld [vmem:[%s3250_s3 + $0x58] sm:$0xf0]  ;;  %v2705_v9 = vor.u32 %v2157_v0, %v2025_v63 }
  0x2a   : > { %800 = vmatpush.bf16.msrb.mxu0 %v2628_v48  ;;  %813 = vmatpush.bf16.msrb.mxu1 %v2630_v49  ;;  %v2049_v7 = vld [vmem:[%s3250_s3 + $0x68] sm:$0xf]  ;;  %v2162_v8 = vld [vmem:[%s3250_s3 + $0x74] sm:$0xf0]  ;;  %v2707_v12 = vor.u32 %v2155_v3, %v2027_v4  ;;  %v2009_v13 = vld [vmem:[%s3250_s3 + $0x20] sm:$0xf]  ;;  %v2717_v16 = vor.u32 %v2156_v5, %v2035_v6 }
  0x2b   : > { %839 = vmatpush.bf16.msrb.mxu3 %v2640_v52  ;;  %825 = vmatpush.bf16.msrb.mxu2 %v2642_v53  ;;  %v2153_v15 = vld [vmem:[%s3250_s3 + $0x2c] sm:$0xf0]  ;;  %v2719_v17 = vor.u32 %v2162_v8, %v2049_v7  ;;  %v2151_v19 = vld [vmem:[%s3250_s3 + $0x24] sm:$0xf]  ;;  %v2011_v20 = vld [vmem:[%s3250_s3 + $0x30] sm:$0xf0] }
  0x2c   : > { %1961 = vmatmul.msk.f32.gmra.mxu0 %vm377_vm0, %v357_v60  ;;  %1969 = vmatmul.msk.f32.gmra.mxu1 %vm377_vm0, %v357_v60  ;;  %v2033_v21 = vld [vmem:[%s3250_s3 + $0x48] sm:$0xf]  ;;  %v2158_v22 = vld [vmem:[%s3250_s3 + $0x54] sm:$0xf0]  ;;  %v2152_v25 = vld [vmem:[%s3250_s3 + $0x2c] sm:$0xf]  ;;  %v2742_v29 = vor.u32 %v2153_v15, %v2009_v13  ;;  %v2744_v30 = vor.u32 %v2151_v19, %v2011_v20 }
  0x2d   : > { %1977 = vmatmul.msk.f32.gmra.mxu2 %vm377_vm0, %v357_v60  ;;  %1985 = vmatmul.msk.f32.gmra.mxu3 %vm377_vm0, %v357_v60  ;;  %v2019_v26 = vld [vmem:[%s3250_s3 + $0x38] sm:$0xf0]  ;;  %v2748_v31 = vor.u32 %v2158_v22, %v2033_v21  ;;  %v2017_v33 = vld [vmem:[%s3250_s3 + $0x28] sm:$0xf]  ;;  %v2154_v36 = vld [vmem:[%s3250_s3 + $0x34] sm:$0xf0] }
  0x2e   : > { %801 = vmatpush.bf16.msrb.mxu0 %v2665_v61  ;;  %814 = vmatpush.bf16.msrb.mxu1 %v2667_v62  ;;  %v358_v28 = vld [vmem:[%s2482_s21 + $0x18] sm:$0xff]  ;;  %v2750_v32 = vor.u32 %v2152_v25, %v2019_v26  ;;  %v1993_v37 = vld [vmem:[%s3250_s3] sm:$0xf]  ;;  %v2149_v40 = vld [vmem:[%s3250_s3 + $0xc] sm:$0xf0]  ;;  %v2782_v45 = vor.u32 %v2154_v36, %v2017_v33 }
  0x2f   : > { %840 = vmatpush.bf16.msrb.mxu3 %v2677_v1  ;;  %826 = vmatpush.bf16.msrb.mxu2 %v2679_v2  ;;  %v2147_v41 = vld [vmem:[%s3250_s3 + $0x4] sm:$0xf]  ;;  %v2773_v42 = vor.u32 %v2149_v40, %v1993_v37  ;;  %v1995_v43 = vld [vmem:[%s3250_s3 + $0x10] sm:$0xf0]  ;;  %v2148_v46 = vld [vmem:[%s3250_s3 + $0xc] sm:$0xf] }
  0x30   : > { %v2780_v44 = vor.u32 %v2147_v41, %v1995_v43  ;;  %v2003_v47 = vld [vmem:[%s3250_s3 + $0x18] sm:$0xf0]  ;;  %v2001_v50 = vld [vmem:[%s3250_s3 + $0x8] sm:$0xf]  ;;  %v2150_v51 = vld [vmem:[%s3250_s3 + $0x14] sm:$0xf0] }
  0x31   : > { %v2796_v54 = vor.u32 %v2148_v46, %v2003_v47  ;;  %v359_v55 = vld [vmem:[%s2482_s21 + $0x20] sm:$0xff]  ;;  %v2802_v56 = vor.u32 %v2150_v51, %v2001_v50  ;;  %v360_v57 = vld [vmem:[%s2482_s21 + $0x28] sm:$0xff]  ;;  %v361_v58 = vld [vmem:[%s2482_s21 + $0x30] sm:$0xff] }
  0x32   : > { %802 = vmatpush.bf16.msrb.mxu0 %v2705_v9  ;;  %815 = vmatpush.bf16.msrb.mxu1 %v2707_v12  ;;  %v362_v59 = vld [vmem:[%s2482_s21 + $0x38] sm:$0xff]  ;;  %v630_v60 = vld [vmem:[#allocation3] sm:$0xff] }
  0x33   : > { %841 = vmatpush.bf16.msrb.mxu3 %v2717_v16  ;;  %827 = vmatpush.bf16.msrb.mxu2 %v2719_v17  ;;  %v636_v63 = vpack.c.bf16 %v630_v60, %v630_v60  ;;  %v367_v4 = vld [vmem:[%s3249_s2] sm:$0xf] }
  0x34   : > { %1962 = vmatmul.msk.f32.gmra.mxu0 %vm377_vm0, %v358_v28  ;;  %1970 = vmatmul.msk.f32.gmra.mxu1 %vm377_vm0, %v358_v28  ;;  %v369_v5 = vperm.slane %v367_v4, 0  ;;  %v370_v6 = vperm.slane %v367_v4, 1  ;;  %v2900_v21 = vperm.slane %v367_v4, 2  ;;  %v372_v22 = vperm.slane %v367_v4, 3 }
  0x35   : > { %1978 = vmatmul.msk.f32.gmra.mxu2 %vm377_vm0, %v358_v28  ;;  %1986 = vmatmul.msk.f32.gmra.mxu3 %vm377_vm0, %v358_v28 }
  0x36   : > { %803 = vmatpush.bf16.msrb.mxu0 %v2742_v29  ;;  %816 = vmatpush.bf16.msrb.mxu1 %v2744_v30 }
  0x37   : > { %828 = vmatpush.bf16.msrb.mxu2 %v2748_v31  ;;  %842 = vmatpush.bf16.msrb.mxu3 %v2750_v32 }
  0x3a   : > { %804 = vmatpush.bf16.msrb.mxu0 %v2773_v42  ;;  %817 = vmatpush.bf16.msrb.mxu1 %v2780_v44 }
  0x3b   : > { %829 = vmatpush.bf16.msrb.mxu2 %v2782_v45  ;;  %843 = vmatpush.bf16.msrb.mxu3 %v2796_v54 }
  0x3c   : > { %1963 = vmatmul.msk.f32.gmra.mxu0 %vm377_vm0, %v359_v55  ;;  %1971 = vmatmul.msk.f32.gmra.mxu1 %vm377_vm0, %v359_v55 }
  0x3d   : > { %1979 = vmatmul.msk.f32.gmra.mxu2 %vm377_vm0, %v359_v55  ;;  %1987 = vmatmul.msk.f32.gmra.mxu3 %vm377_vm0, %v359_v55 }
  0x3e   : > { %921 = vmatpush.bf16.msra.mxu0 %v2512_v10  ;;  %934 = vmatpush.bf16.msra.mxu1 %v2514_v11 }
  0x3f   : > { %830 = vmatpush.bf16.msrb.mxu2 %v2802_v56  ;;  %960 = vmatpush.bf16.msra.mxu3 %v2524_v14 }
  0x42   : > { %922 = vmatpush.bf16.msra.mxu0 %v2537_v18  ;;  %935 = vmatpush.bf16.msra.mxu1 %v2550_v23 }
  0x43   : > { %947 = vmatpush.bf16.msra.mxu2 %v2560_v27  ;;  %961 = vmatpush.bf16.msra.mxu3 %v2552_v24 }
  0x44   : > { %1964 = vmatmul.msk.f32.gmra.mxu0 %vm377_vm0, %v360_v57  ;;  %1972 = vmatmul.msk.f32.gmra.mxu1 %vm377_vm0, %v360_v57 }
  0x45   : > { %1980 = vmatmul.msk.f32.gmra.mxu2 %vm377_vm0, %v360_v57  ;;  %1988 = vmatmul.msk.f32.gmra.mxu3 %vm377_vm0, %v360_v57 }
  0x46   : > { %923 = vmatpush.bf16.msra.mxu0 %v2582_v34  ;;  %936 = vmatpush.bf16.msra.mxu1 %v2584_v35 }
  0x47   : > { %948 = vmatpush.bf16.msra.mxu2 %v2596_v39  ;;  %962 = vmatpush.bf16.msra.mxu3 %v2594_v38 }
  0x4a   : > { %924 = vmatpush.bf16.msra.mxu0 %v2628_v48  ;;  %937 = vmatpush.bf16.msra.mxu1 %v2630_v49 }
  0x4b   : > { %949 = vmatpush.bf16.msra.mxu2 %v2642_v53  ;;  %963 = vmatpush.bf16.msra.mxu3 %v2640_v52 }
  0x4c   : > { %1965 = vmatmul.msk.f32.gmra.mxu0 %vm377_vm0, %v361_v58  ;;  %1973 = vmatmul.msk.f32.gmra.mxu1 %vm377_vm0, %v361_v58 }
  0x4d   : > { %1981 = vmatmul.msk.f32.gmra.mxu2 %vm377_vm0, %v361_v58  ;;  %1989 = vmatmul.msk.f32.gmra.mxu3 %vm377_vm0, %v361_v58 }
  0x4e   : > { %925 = vmatpush.bf16.msra.mxu0 %v2665_v61  ;;  %938 = vmatpush.bf16.msra.mxu1 %v2667_v62 }
  0x4f   : > { %950 = vmatpush.bf16.msra.mxu2 %v2679_v2  ;;  %964 = vmatpush.bf16.msra.mxu3 %v2677_v1 }
  0x52   : > { %926 = vmatpush.bf16.msra.mxu0 %v2705_v9  ;;  %939 = vmatpush.bf16.msra.mxu1 %v2707_v12 }
  0x53   : > { %951 = vmatpush.bf16.msra.mxu2 %v2719_v17  ;;  %965 = vmatpush.bf16.msra.mxu3 %v2717_v16 }
  0x54   : > { %1966 = vmatmul.msk.f32.gmra.mxu0 %vm377_vm0, %v362_v59  ;;  %1974 = vmatmul.msk.f32.gmra.mxu1 %vm377_vm0, %v362_v59 }
  0x55   : > { %1982 = vmatmul.msk.f32.gmra.mxu2 %vm377_vm0, %v362_v59  ;;  %1990 = vmatmul.msk.f32.gmra.mxu3 %vm377_vm0, %v362_v59 }
  0x56   : > { %927 = vmatpush.bf16.msra.mxu0 %v2742_v29  ;;  %940 = vmatpush.bf16.msra.mxu1 %v2744_v30 }
  0x57   : > { %952 = vmatpush.bf16.msra.mxu2 %v2748_v31  ;;  %966 = vmatpush.bf16.msra.mxu3 %v2750_v32 }
  0x5a   : > { %928 = vmatpush.bf16.msra.mxu0 %v2773_v42  ;;  %941 = vmatpush.bf16.msra.mxu1 %v2780_v44 }
  0x5b   : > { %953 = vmatpush.bf16.msra.mxu2 %v2782_v45  ;;  %967 = vmatpush.bf16.msra.mxu3 %v2796_v54 }
  0x5c   : > { %805 = vmatmul.bf16.vlgmr.msrb.gmra.mxu0 %v636_v63  ;;  %818 = vmatmul.bf16.vlgmr.msrb.gmra.mxu1 %v636_v63 }
  0x5d   : > { %831 = vmatmul.bf16.vlgmr.msrb.gmra.mxu2 %v636_v63  ;;  %844 = vmatmul.bf16.vlgmr.msrb.gmra.mxu3 %v636_v63 }
  0x5e   : > { %1045 = vmatpush.bf16.msrb.mxu0 %v2512_v10  ;;  %1058 = vmatpush.bf16.msrb.mxu1 %v2514_v11 }
  0x5f   : > { %954 = vmatpush.bf16.msra.mxu2 %v2802_v56  ;;  %1084 = vmatpush.bf16.msrb.mxu3 %v2524_v14 }
  0x62   : > { %1046 = vmatpush.bf16.msrb.mxu0 %v2537_v18  ;;  %1059 = vmatpush.bf16.msrb.mxu1 %v2550_v23 }
  0x63   : > { %1071 = vmatpush.bf16.msrb.mxu2 %v2560_v27  ;;  %1085 = vmatpush.bf16.msrb.mxu3 %v2552_v24 }
  0x66   : > { %1047 = vmatpush.bf16.msrb.mxu0 %v2582_v34  ;;  %1060 = vmatpush.bf16.msrb.mxu1 %v2584_v35 }
  0x67   : > { %1072 = vmatpush.bf16.msrb.mxu2 %v2596_v39  ;;  %1086 = vmatpush.bf16.msrb.mxu3 %v2594_v38 }
  0x6a   : > { %1048 = vmatpush.bf16.msrb.mxu0 %v2628_v48  ;;  %1061 = vmatpush.bf16.msrb.mxu1 %v2630_v49 }
  0x6b   : > { %1073 = vmatpush.bf16.msrb.mxu2 %v2642_v53  ;;  %1087 = vmatpush.bf16.msrb.mxu3 %v2640_v52 }
  0x6e   : > { %1049 = vmatpush.bf16.msrb.mxu0 %v2665_v61  ;;  %1062 = vmatpush.bf16.msrb.mxu1 %v2667_v62 }
  0x6f   : > { %1074 = vmatpush.bf16.msrb.mxu2 %v2679_v2  ;;  %1088 = vmatpush.bf16.msrb.mxu3 %v2677_v1 }
  0x72   : > { %1050 = vmatpush.bf16.msrb.mxu0 %v2705_v9  ;;  %1063 = vmatpush.bf16.msrb.mxu1 %v2707_v12 }
  0x73   : > { %1075 = vmatpush.bf16.msrb.mxu2 %v2719_v17  ;;  %1089 = vmatpush.bf16.msrb.mxu3 %v2717_v16 }
  0x76   : > { %1051 = vmatpush.bf16.msrb.mxu0 %v2742_v29  ;;  %1064 = vmatpush.bf16.msrb.mxu1 %v2744_v30 }
  0x77   : > { %1076 = vmatpush.bf16.msrb.mxu2 %v2748_v31  ;;  %1090 = vmatpush.bf16.msrb.mxu3 %v2750_v32 }
  0x7a   : > { %1052 = vmatpush.bf16.msrb.mxu0 %v2773_v42  ;;  %1065 = vmatpush.bf16.msrb.mxu1 %v2780_v44 }
  0x7b   : > { %1077 = vmatpush.bf16.msrb.mxu2 %v2782_v45  ;;  %1091 = vmatpush.bf16.msrb.mxu3 %v2796_v54 }
  0x7f   : > { %1078 = vmatpush.bf16.msrb.mxu2 %v2802_v56 }
  0x99   : > { %v419_v0 = vpop.f32.mrf.mxu0  ;;  %v460_v3 = vpop.f32.mrf.mxu1 }
  0xa0   : > { %v2892_v7 = vpop.f32.mrf.mxu2  ;;  %v2894_v8 = vpop.f32.mrf.mxu3 }
  0xa1   : > { %v422_v13 = vpop.f32.mrf.mxu0  ;;  %v463_v15 = vpop.f32.mrf.mxu1 }
  0xa2   : > { %v2896_v19 = vadd.f32 %v422_v13, %v369_v5  ;;  %v2898_v20 = vadd.f32 %v463_v15, %v370_v6 }
  0xa8   : > { %v504_v25 = vpop.f32.mrf.mxu2  ;;  %v545_v26 = vpop.f32.mrf.mxu3 }
  0xa9   : > { %v2903_v28 = vadd.f32 %v504_v25, %v2900_v21  ;;  %v2905_v33 = vadd.f32 %v545_v26, %v372_v22  ;;  %v425_v36 = vpop.f32.mrf.mxu0  ;;  %v466_v37 = vpop.f32.mrf.mxu1 }
  0xaa   : > { %v2907_v40 = vadd.f32 %v425_v36, %v369_v5  ;;  %v2909_v41 = vadd.f32 %v466_v37, %v370_v6 }
  0xb0   : > { %v507_v43 = vpop.f32.mrf.mxu2  ;;  %v548_v46 = vpop.f32.mrf.mxu3 }
  0xb1   : > { %v2912_v47 = vadd.f32 %v507_v43, %v2900_v21  ;;  %v2914_v50 = vadd.f32 %v548_v46, %v372_v22  ;;  %v428_v51 = vpop.f32.mrf.mxu0  ;;  %v469_v55 = vpop.f32.mrf.mxu1 }
  0xb2   : > { %v2916_v57 = vadd.f32 %v428_v51, %v369_v5  ;;  %v2918_v58 = vadd.f32 %v469_v55, %v370_v6 }
  0xb3   : > { %3256 = vst [vmem:[#allocation8_spill] sm:$0xff] %v2912_v47 }
  0xb4   : > { %3257 = vst [vmem:[#allocation9_spill] sm:$0xff] %v2914_v50 }
  0xb5   : > { %3258 = vst [vmem:[#allocation10_spill] sm:$0xff] %v2916_v57 }
  0xb6   : > { %3259 = vst [vmem:[#allocation11_spill] sm:$0xff] %v2918_v58 }
  0xb8   : > { %v510_v59 = vpop.f32.mrf.mxu2  ;;  %v551_v60 = vpop.f32.mrf.mxu3 }
  0xb9   : > { %v2921_v63 = vadd.f32 %v510_v59, %v2900_v21  ;;  %v2923_v4 = vadd.f32 %v551_v60, %v372_v22  ;;  %v431_v13 = vpop.f32.mrf.mxu0  ;;  %v472_v15 = vpop.f32.mrf.mxu1 }
  0xba   : > { %v2925_v25 = vadd.f32 %v431_v13, %v369_v5  ;;  %v2927_v26 = vadd.f32 %v472_v15, %v370_v6 }
  0xbb   : > { %3260 = vst [vmem:[#allocation12_spill] sm:$0xff] %v2921_v63 }
  0xbc   : > { %3261 = vst [vmem:[#allocation13_spill] sm:$0xff] %v2923_v4 }
  0xbd   : > { %3262 = vst [vmem:[#allocation14_spill] sm:$0xff] %v2925_v25 }
  0xbe   : > { %3263 = vst [vmem:[#allocation15_spill] sm:$0xff] %v2927_v26 }
  0xc0   : > { %v513_v36 = vpop.f32.mrf.mxu2  ;;  %v554_v37 = vpop.f32.mrf.mxu3 }
  0xc1   : > { %v2930_v43 = vadd.f32 %v513_v36, %v2900_v21  ;;  %v2932_v46 = vadd.f32 %v554_v37, %v372_v22  ;;  %v434_v51 = vpop.f32.mrf.mxu0  ;;  %v475_v55 = vpop.f32.mrf.mxu1 }
  0xc2   : > { %v2934_v58 = vadd.f32 %v434_v51, %v369_v5  ;;  %v2936_v59 = vadd.f32 %v475_v55, %v370_v6 }
  0xc3   : > { %3264 = vst [vmem:[#allocation16_spill] sm:$0xff] %v2930_v43 }
  0xc4   : > { %3265 = vst [vmem:[#allocation17_spill] sm:$0xff] %v2932_v46 }
  0xc5   : > { %3266 = vst [vmem:[#allocation18_spill] sm:$0xff] %v2934_v58 }
  0xc6   : > { %3267 = vst [vmem:[#allocation19_spill] sm:$0xff] %v2936_v59 }
  0xc8   : > { %v516_v60 = vpop.f32.mrf.mxu2  ;;  %v557_v63 = vpop.f32.mrf.mxu3 }
  0xc9   : > { %v2939_v13 = vadd.f32 %v516_v60, %v2900_v21  ;;  %v2941_v15 = vadd.f32 %v557_v63, %v372_v22  ;;  %v437_v26 = vpop.f32.mrf.mxu0  ;;  %v478_v25 = vpop.f32.mrf.mxu1  ;;  %v420_v63 = vadd.f32 %v419_v0, %v369_v5 }
  0xca   : > { %v2943_v4 = vadd.f32 %v437_v26, %v369_v5  ;;  %v2945_v36 = vadd.f32 %v478_v25, %v370_v6 }
  0xcb   : > { %3268 = vst [vmem:[#allocation20_spill] sm:$0xff] %v2939_v13  ;;  %v461_v13 = vadd.f32 %v460_v3, %v370_v6 }
  0xcc   : > { %3269 = vst [vmem:[#allocation21_spill] sm:$0xff] %v2941_v15 }
  0xcd   : > { %3270 = vst [vmem:[#allocation22_spill] sm:$0xff] %v2943_v4 }
  0xce   : > { %3271 = vst [vmem:[#allocation23_spill] sm:$0xff] %v2945_v36 }
  0xd0   : > { %v519_v37 = vpop.f32.mrf.mxu2  ;;  %v560_v43 = vpop.f32.mrf.mxu3 }
  0xd1   : > { %v2948_v51 = vadd.f32 %v519_v37, %v2900_v21  ;;  %v2950_v55 = vadd.f32 %v560_v43, %v372_v22  ;;  %v440_v59 = vpop.f32.mrf.mxu0  ;;  %v481_v58 = vpop.f32.mrf.mxu1 }
  0xd2   : > { %v2952_v46 = vadd.f32 %v440_v59, %v369_v5  ;;  %v2954_v60 = vadd.f32 %v481_v58, %v370_v6  ;;  %v543_v59 = vadd.f32 %v2894_v8, %v372_v22  ;;  %v502_v8 = vadd.f32 %v2892_v7, %v2900_v21 }
  0xd3   : > { %3272 = vst [vmem:[#allocation24_spill] sm:$0xff] %v2948_v51 }
  0xd4   : > { %3273 = vst [vmem:[#allocation25_spill] sm:$0xff] %v2950_v55 }
  0xd5   : > { %3274 = vst [vmem:[#allocation26_spill] sm:$0xff] %v2952_v46 }
  0xd6   : > { %3275 = vst [vmem:[#allocation27_spill] sm:$0xff] %v2954_v60 }
  0xd8   : > { %v522_v15 = vpop.f32.mrf.mxu2  ;;  %v563_v26 = vpop.f32.mrf.mxu3 }
  0xd9   : > { %v2957_v25 = vadd.f32 %v522_v15, %v2900_v21  ;;  %v2959_v36 = vadd.f32 %v563_v26, %v372_v22  ;;  %v806_v4 = vpop.f32.mrf.mxu0  ;;  %v819_v37 = vpop.f32.mrf.mxu1 }
  0xda   : > { %v849_v51 = vadd.f32 %v806_v4, %v420_v63  ;;  %v850_v43 = vadd.f32 %v819_v37, %v461_v13 }
  0xdb   : > { %3276 = vst [vmem:[#allocation28_spill] sm:$0xff] %v2957_v25 }
  0xdc   : > { %3277 = vst [vmem:[#allocation29_spill] sm:$0xff] %v2959_v36  ;;  %v2119_v55 = vmul.f32 -1.442695, %v849_v51  ;;  %v2120_v57 = vmul.f32 -1.442695, %v850_v43 }
  0xde   : > { %2217 = vpow2.f32 %v2119_v55 }
  0xdf   : > { %2219 = vpow2.f32 %v2120_v57 }
  0xe0   : > { %v832_v58 = vpop.f32.mrf.mxu2  ;;  %v845_v0 = vpop.f32.mrf.mxu3 }
  0xe1   : > { %v852_v3 = vadd.f32 %v845_v0, %v543_v59  ;;  %v808_v5 = vpop.f32.mrf.mxu0  ;;  %v821_v6 = vpop.f32.mrf.mxu1  ;;  %v851_v55 = vadd.f32 %v832_v58, %v502_v8  ;;  %v631_v8 = vld [vmem:[#allocation4] sm:$0xff] }
  0xe3   : > { %v2121_v60 = vmul.f32 -1.442695, %v852_v3 }
  0xe4   : > { %v2218_v15 = vpop.eup %2217 }
  0xe5   : > { %v2220_v25 = vpop.eup %2219  ;;  %v856_v26 = vadd.f32 1.0, %v2218_v15  ;;  %2221 = vpow2.f32 %v2121_v60 }
  0xe6   : > { %v875_v36 = vadd.f32 1.0, %v2220_v25 }
  0xe7   : > { %2223 = vrcp.f32 %v856_v26  ;;  %v868_v3 = vand.u32 2147483648, %v856_v26  ;;  %v866_v5 = vand.u32 2147483647, %v856_v26  ;;  %vm862_vm3 = vweird.f32 %v856_v26 }
  0xe8   : > { %2225 = vrcp.f32 %v875_v36  ;;  %v847_v4 = vpop.f32.mrf.mxu3  ;;  %v834_v13 = vpop.f32.mrf.mxu2  ;;  %v887_v60 = vand.u32 2147483648, %v875_v36  ;;  %v885_v15 = vand.u32 2147483647, %v875_v36  ;;  %vm881_vm4 = vweird.f32 %v875_v36 }
  0xe9   : > { %v869_v21 = vor.u32 1.1754944e-38, %v868_v3  ;;  %vm867_vm7 = vcmp.eq.f32.partialorder %v866_v5, 8.507059e+37 }
  0xea   : > { %vm886_vm8 = vcmp.eq.f32.partialorder %v885_v15, 8.507059e+37 }
  0xeb   : > { %v2222_v51 = vpop.eup %2221 }
  0xec   : > { %v895_v22 = vadd.f32 1.0, %v2222_v51  ;;  %v888_v51 = vor.u32 1.1754944e-38, %v887_v60 }
  0xed   : > { %v2224_v57 = vpop.eup %2223 }
  0xee   : > { %v2226_v63 = vpop.eup %2225  ;;  %v858_v37 = vmul.f32 %v2224_v57, %v856_v26  ;;  %2227 = vrcp.f32 %v895_v22  ;;  %vm863_vm1 = vweird.f32 %v2224_v57  ;;  %v907_v3 = vand.u32 2147483648, %v895_v22 }
  0xef   : > { %v877_v43 = vmul.f32 %v2226_v63, %v875_v36  ;;  %2229 = vtanh.f32 %v851_v55  ;;  %vm882_vm2 = vweird.f32 %v2226_v63  ;;  %vm864_vm5 = vmor %vm862_vm3, %vm863_vm1  ;;  %vm901_vm10 = vweird.f32 %v895_v22 }
  0xf0   : > { %v859_v59 = vsub.f32 1.0, %v858_v37  ;;  %vm883_vm6 = vmor %vm881_vm4, %vm882_vm2  ;;  %v905_v60 = vand.u32 2147483647, %v895_v22  ;;  %v908_v5 = vor.u32 1.1754944e-38, %v907_v3 }
  0xf1   : > { %v878_v0 = vsub.f32 1.0, %v877_v43 }
  0xf2   : > { %v860_v25 = vmul.f32 %v2224_v57, %v859_v59  ;;  %vm906_vm12 = vcmp.eq.f32.partialorder %v905_v60, 8.507059e+37 }
  0xf3   : > { %v879_v6 = vmul.f32 %v2226_v63, %v878_v0 }
  0xf4   : > { %v2228_v4 = vpop.eup %2227  ;;  %v861_v7 = vadd.f32 %v2224_v57, %v860_v25 }
  0xf5   : > { %v880_v58 = vadd.f32 %v2226_v63, %v879_v6  ;;  %v897_v13 = vmul.f32 %v2228_v4, %v895_v22  ;;  %v2230_v55 = vpop.eup %2229  ;;  %vm902_vm9 = vweird.f32 %v2228_v4 }
  0xf6   : > { %v865_v37 = vsel %vm864_vm5, %v2224_v57, %v861_v7  ;;  %vm903_vm11 = vmor %vm901_vm10, %vm902_vm9 }
  0xf7   : > { %v870_v43 = vsel %vm867_vm7, %v869_v21, %v865_v37  ;;  %v884_v59 = vsel %vm883_vm6, %v2226_v63, %v880_v58  ;;  %v898_v0 = vsub.f32 1.0, %v897_v13 }
  0xf8   : > { %v889_v46 = vsel %vm886_vm8, %v888_v51, %v884_v59  ;;  %v912_v47 = vmul.f32 %v2230_v55, %v870_v43 }
  0xf9   : > { %v911_v50 = vmul.f32 %v889_v46, %v631_v8  ;;  %v899_v25 = vmul.f32 %v2228_v4, %v898_v0 }
  0xfb   : > { %v2964_v26 = vadd.f32 %v912_v47, %v911_v50  ;;  %v900_v36 = vadd.f32 %v2228_v4, %v899_v25 }
  0xfd   : > { %2231 = vtanh.f32 %v2964_v26  ;;  %v904_v57 = vsel %vm903_vm11, %v2228_v4, %v900_v36 }
  0xfe   : > { %v909_v6 = vsel %vm906_vm12, %v908_v5, %v904_v57 }
 0x103   : > { %v2232_v63 = vpop.eup %2231 }
 0x104   : > { %v915_v15 = vmul.f32 %v2232_v63, %v909_v6 }
 0x106   : > { %v920_v7 = vpack.c.bf16 %v915_v15, %v915_v15 }
 0x108   : > { %929 = vmatmul.bf16.vlgmr.msra.gmra.mxu0 %v920_v7  ;;  %942 = vmatmul.bf16.vlgmr.msra.gmra.mxu1 %v920_v7 }
 0x109   : > { %955 = vmatmul.bf16.vlgmr.msra.gmra.mxu2 %v920_v7  ;;  %968 = vmatmul.bf16.vlgmr.msra.gmra.mxu3 %v920_v7 }
 0x10a   : > { %1169 = vmatpush.bf16.msra.mxu0 %v2512_v10  ;;  %1182 = vmatpush.bf16.msra.mxu1 %v2514_v11 }
 0x10b   : > { %1195 = vmatpush.bf16.msra.mxu2 %v2560_v27  ;;  %1208 = vmatpush.bf16.msra.mxu3 %v2524_v14 }
 0x10e   : > { %1170 = vmatpush.bf16.msra.mxu0 %v2537_v18  ;;  %1183 = vmatpush.bf16.msra.mxu1 %v2550_v23 }
 0x10f   : > { %1196 = vmatpush.bf16.msra.mxu2 %v2596_v39  ;;  %1209 = vmatpush.bf16.msra.mxu3 %v2552_v24 }
 0x112   : > { %1171 = vmatpush.bf16.msra.mxu0 %v2582_v34  ;;  %1184 = vmatpush.bf16.msra.mxu1 %v2584_v35 }
 0x113   : > { %1197 = vmatpush.bf16.msra.mxu2 %v2642_v53  ;;  %1210 = vmatpush.bf16.msra.mxu3 %v2594_v38 }
 0x116   : > { %1172 = vmatpush.bf16.msra.mxu0 %v2628_v48  ;;  %1185 = vmatpush.bf16.msra.mxu1 %v2630_v49 }
 0x117   : > { %1198 = vmatpush.bf16.msra.mxu2 %v2679_v2  ;;  %1211 = vmatpush.bf16.msra.mxu3 %v2640_v52 }
 0x11a   : > { %1173 = vmatpush.bf16.msra.mxu0 %v2665_v61  ;;  %1186 = vmatpush.bf16.msra.mxu1 %v2667_v62 }
 0x11b   : > { %1199 = vmatpush.bf16.msra.mxu2 %v2719_v17  ;;  %1212 = vmatpush.bf16.msra.mxu3 %v2677_v1 }
 0x11e   : > { %1174 = vmatpush.bf16.msra.mxu0 %v2705_v9  ;;  %1187 = vmatpush.bf16.msra.mxu1 %v2707_v12 }
 0x11f   : > { %1200 = vmatpush.bf16.msra.mxu2 %v2748_v31  ;;  %1213 = vmatpush.bf16.msra.mxu3 %v2717_v16 }
 0x122   : > { %1175 = vmatpush.bf16.msra.mxu0 %v2742_v29  ;;  %1188 = vmatpush.bf16.msra.mxu1 %v2744_v30 }
 0x123   : > { %1201 = vmatpush.bf16.msra.mxu2 %v2782_v45  ;;  %1214 = vmatpush.bf16.msra.mxu3 %v2750_v32 }
 0x126   : > { %1176 = vmatpush.bf16.msra.mxu0 %v2773_v42  ;;  %1189 = vmatpush.bf16.msra.mxu1 %v2780_v44 }
 0x127   : > { %1202 = vmatpush.bf16.msra.mxu2 %v2802_v56  ;;  %1215 = vmatpush.bf16.msra.mxu3 %v2796_v54 }
 0x185   : > { %v930_v47 = vpop.f32.mrf.mxu0  ;;  %v943_v50 = vpop.f32.mrf.mxu1 }
 0x186   : > { %v973_v46 = vadd.f32 %v930_v47, %v2896_v19  ;;  %v974_v22 = vadd.f32 %v943_v50, %v2898_v20 }
 0x188   : > { %v2122_v4 = vmul.f32 -1.442695, %v973_v46  ;;  %v2123_v21 = vmul.f32 -1.442695, %v974_v22 }
 0x18a   : > { %2233 = vpow2.f32 %v2122_v4 }
 0x18b   : > { %2235 = vpow2.f32 %v2123_v21 }
 0x18c   : > { %v956_v58 = vpop.f32.mrf.mxu2  ;;  %v969_v13 = vpop.f32.mrf.mxu3 }
 0x18d   : > { %v976_v51 = vadd.f32 %v969_v13, %v2905_v33  ;;  %v932_v8 = vpop.f32.mrf.mxu0  ;;  %v945_v37 = vpop.f32.mrf.mxu1  ;;  %v975_v57 = vadd.f32 %v956_v58, %v2903_v28 }
 0x18f   : > { %v2124_v55 = vmul.f32 -1.442695, %v976_v51 }
 0x190   : > { %v2234_v43 = vpop.eup %2233 }
 0x191   : > { %v2236_v59 = vpop.eup %2235  ;;  %v980_v0 = vadd.f32 1.0, %v2234_v43  ;;  %2237 = vpow2.f32 %v2124_v55 }
 0x192   : > { %v999_v25 = vadd.f32 1.0, %v2236_v59 }
 0x193   : > { %2239 = vrcp.f32 %v980_v0  ;;  %v992_v7 = vand.u32 2147483648, %v980_v0  ;;  %v990_v46 = vand.u32 2147483647, %v980_v0  ;;  %vm986_vm15 = vweird.f32 %v980_v0 }
 0x194   : > { %2241 = vrcp.f32 %v999_v25  ;;  %v958_v19 = vpop.f32.mrf.mxu2  ;;  %v971_v20 = vpop.f32.mrf.mxu3  ;;  %v1011_v47 = vand.u32 2147483648, %v999_v25  ;;  %v1009_v4 = vand.u32 2147483647, %v999_v25  ;;  %vm1005_vm0 = vweird.f32 %v999_v25 }
 0x195   : > { %v993_v28 = vor.u32 1.1754944e-38, %v992_v7  ;;  %vm991_vm3 = vcmp.eq.f32.partialorder %v990_v46, 8.507059e+37 }
 0x196   : > { %v1012_v8 = vor.u32 1.1754944e-38, %v1011_v47  ;;  %vm1010_vm4 = vcmp.eq.f32.partialorder %v1009_v4, 8.507059e+37 }
 0x197   : > { %v2238_v36 = vpop.eup %2237 }
 0x198   : > { %v1019_v3 = vadd.f32 1.0, %v2238_v36 }
 0x199   : > { %v2240_v60 = vpop.eup %2239 }
 0x19a   : > { %v2242_v5 = vpop.eup %2241  ;;  %v982_v63 = vmul.f32 %v2240_v60, %v980_v0  ;;  %2243 = vrcp.f32 %v1019_v3  ;;  %vm987_vm13 = vweird.f32 %v2240_v60  ;;  %vm1025_vm6 = vweird.f32 %v1019_v3 }
 0x19b   : > { %v1001_v33 = vmul.f32 %v2242_v5, %v999_v25  ;;  %2245 = vtanh.f32 %v975_v57  ;;  %vm1006_vm14 = vweird.f32 %v2242_v5  ;;  %vm988_vm1 = vmor %vm986_vm15, %vm987_vm13 }
 0x19c   : > { %v983_v6 = vsub.f32 1.0, %v982_v63  ;;  %vm1007_vm2 = vmor %vm1005_vm0, %vm1006_vm14 }
 0x19d   : > { %v1002_v15 = vsub.f32 1.0, %v1001_v33  ;;  %v1031_v33 = vand.u32 2147483648, %v1019_v3 }
 0x19e   : > { %v984_v50 = vmul.f32 %v2240_v60, %v983_v6 }
 0x19f   : > { %v1003_v22 = vmul.f32 %v2242_v5, %v1002_v15  ;;  %v1032_v15 = vor.u32 1.1754944e-38, %v1031_v33 }
 0x1a0   : > { %v2244_v21 = vpop.eup %2243  ;;  %v985_v13 = vadd.f32 %v2240_v60, %v984_v50 }
 0x1a1   : > { %v1004_v58 = vadd.f32 %v2242_v5, %v1003_v22  ;;  %v1021_v51 = vmul.f32 %v2244_v21, %v1019_v3  ;;  %v2246_v55 = vpop.eup %2245  ;;  %vm1026_vm5 = vweird.f32 %v2244_v21 }
 0x1a2   : > { %v989_v37 = vsel %vm988_vm1, %v2240_v60, %v985_v13  ;;  %v1029_v60 = vand.u32 2147483647, %v1019_v3  ;;  %vm1027_vm7 = vmor %vm1025_vm6, %vm1026_vm5 }
 0x1a3   : > { %v994_v43 = vsel %vm991_vm3, %v993_v28, %v989_v37  ;;  %v1008_v59 = vsel %vm1007_vm2, %v2242_v5, %v1004_v58  ;;  %v1022_v19 = vsub.f32 1.0, %v1021_v51  ;;  %v3278_v58 = vld [vmem:[#allocation9_spill] sm:$0xff] }
 0x1a4   : > { %v1013_v20 = vsel %vm1010_vm4, %v1012_v8, %v1008_v59  ;;  %v1036_v36 = vmul.f32 %v2246_v55, %v994_v43  ;;  %vm1030_vm8 = vcmp.eq.f32.partialorder %v1029_v60, 8.507059e+37 }
 0x1a5   : > { %v1035_v57 = vmul.f32 %v1013_v20, %v2964_v26  ;;  %v1023_v63 = vmul.f32 %v2244_v21, %v1022_v19 }
 0x1a7   : > { %v3004_v0 = vadd.f32 %v1036_v36, %v1035_v57  ;;  %v1024_v25 = vadd.f32 %v2244_v21, %v1023_v63 }
 0x1a9   : > { %2247 = vtanh.f32 %v3004_v0  ;;  %v1028_v6 = vsel %vm1027_vm7, %v2244_v21, %v1024_v25  ;;  %v3279_v25 = vld [vmem:[#allocation8_spill] sm:$0xff] }
 0x1aa   : > { %v1033_v7 = vsel %vm1030_vm8, %v1032_v15, %v1028_v6 }
 0x1af   : > { %v2248_v5 = vpop.eup %2247 }
 0x1b0   : > { %v1039_v47 = vmul.f32 %v2248_v5, %v1033_v7 }
 0x1b2   : > { %v1044_v50 = vpack.c.bf16 %v1039_v47, %v1039_v47 }
 0x1b4   : > { %1053 = vmatmul.bf16.vlgmr.msrb.gmra.mxu0 %v1044_v50  ;;  %1066 = vmatmul.bf16.vlgmr.msrb.gmra.mxu1 %v1044_v50 }
 0x1b5   : > { %1079 = vmatmul.bf16.vlgmr.msrb.gmra.mxu2 %v1044_v50  ;;  %1092 = vmatmul.bf16.vlgmr.msrb.gmra.mxu3 %v1044_v50 }
 0x1b6   : > { %1293 = vmatpush.bf16.msrb.mxu0 %v2512_v10  ;;  %1306 = vmatpush.bf16.msrb.mxu1 %v2514_v11 }
 0x1b7   : > { %1319 = vmatpush.bf16.msrb.mxu2 %v2560_v27  ;;  %1332 = vmatpush.bf16.msrb.mxu3 %v2524_v14 }
 0x1ba   : > { %1294 = vmatpush.bf16.msrb.mxu0 %v2537_v18  ;;  %1307 = vmatpush.bf16.msrb.mxu1 %v2550_v23 }
 0x1bb   : > { %1320 = vmatpush.bf16.msrb.mxu2 %v2596_v39  ;;  %1333 = vmatpush.bf16.msrb.mxu3 %v2552_v24 }
 0x1be   : > { %1295 = vmatpush.bf16.msrb.mxu0 %v2582_v34  ;;  %1308 = vmatpush.bf16.msrb.mxu1 %v2584_v35 }
 0x1bf   : > { %1321 = vmatpush.bf16.msrb.mxu2 %v2642_v53  ;;  %1334 = vmatpush.bf16.msrb.mxu3 %v2594_v38 }
 0x1c2   : > { %1296 = vmatpush.bf16.msrb.mxu0 %v2628_v48  ;;  %1309 = vmatpush.bf16.msrb.mxu1 %v2630_v49 }
 0x1c3   : > { %1322 = vmatpush.bf16.msrb.mxu2 %v2679_v2  ;;  %1335 = vmatpush.bf16.msrb.mxu3 %v2640_v52 }
 0x1c6   : > { %1297 = vmatpush.bf16.msrb.mxu0 %v2665_v61  ;;  %1310 = vmatpush.bf16.msrb.mxu1 %v2667_v62 }
 0x1c7   : > { %1323 = vmatpush.bf16.msrb.mxu2 %v2719_v17  ;;  %1336 = vmatpush.bf16.msrb.mxu3 %v2677_v1 }
 0x1ca   : > { %1298 = vmatpush.bf16.msrb.mxu0 %v2705_v9  ;;  %1311 = vmatpush.bf16.msrb.mxu1 %v2707_v12 }
 0x1cb   : > { %1324 = vmatpush.bf16.msrb.mxu2 %v2748_v31  ;;  %1337 = vmatpush.bf16.msrb.mxu3 %v2717_v16 }
 0x1ce   : > { %1299 = vmatpush.bf16.msrb.mxu0 %v2742_v29  ;;  %1312 = vmatpush.bf16.msrb.mxu1 %v2744_v30 }
 0x1cf   : > { %1325 = vmatpush.bf16.msrb.mxu2 %v2782_v45  ;;  %1338 = vmatpush.bf16.msrb.mxu3 %v2750_v32 }
 0x1d2   : > { %1300 = vmatpush.bf16.msrb.mxu0 %v2773_v42  ;;  %1313 = vmatpush.bf16.msrb.mxu1 %v2780_v44 }
 0x1d3   : > { %1326 = vmatpush.bf16.msrb.mxu2 %v2802_v56  ;;  %1339 = vmatpush.bf16.msrb.mxu3 %v2796_v54 }
 0x231   : > { %v1054_v26 = vpop.f32.mrf.mxu0  ;;  %v1067_v3 = vpop.f32.mrf.mxu1 }
 0x232   : > { %v1097_v46 = vadd.f32 %v1054_v26, %v2907_v40  ;;  %v1098_v22 = vadd.f32 %v1067_v3, %v2909_v41 }
 0x234   : > { %v2125_v4 = vmul.f32 -1.442695, %v1097_v46  ;;  %v2126_v21 = vmul.f32 -1.442695, %v1098_v22 }
 0x236   : > { %2249 = vpow2.f32 %v2125_v4 }
 0x237   : > { %2251 = vpow2.f32 %v2126_v21 }
 0x238   : > { %v1080_v13 = vpop.f32.mrf.mxu2  ;;  %v1093_v28 = vpop.f32.mrf.mxu3 }
 0x239   : > { %v1100_v51 = vadd.f32 %v1093_v28, %v3278_v58  ;;  %v1056_v8 = vpop.f32.mrf.mxu0  ;;  %v1069_v37 = vpop.f32.mrf.mxu1  ;;  %v1099_v33 = vadd.f32 %v1080_v13, %v3279_v25 }
 0x23b   : > { %v2127_v55 = vmul.f32 -1.442695, %v1100_v51 }
 0x23c   : > { %v2250_v43 = vpop.eup %2249 }
 0x23d   : > { %v2252_v59 = vpop.eup %2251  ;;  %v1104_v19 = vadd.f32 1.0, %v2250_v43  ;;  %2253 = vpow2.f32 %v2127_v55 }
 0x23e   : > { %v1123_v20 = vadd.f32 1.0, %v2252_v59 }
 0x23f   : > { %2255 = vrcp.f32 %v1104_v19  ;;  %v1116_v47 = vand.u32 2147483648, %v1104_v19  ;;  %v1114_v3 = vand.u32 2147483647, %v1104_v19  ;;  %vm1110_vm11 = vweird.f32 %v1104_v19 }
 0x240   : > { %2257 = vrcp.f32 %v1123_v20  ;;  %v1082_v40 = vpop.f32.mrf.mxu2  ;;  %v1095_v41 = vpop.f32.mrf.mxu3  ;;  %v1135_v50 = vand.u32 2147483648, %v1123_v20  ;;  %v1133_v22 = vand.u32 2147483647, %v1123_v20  ;;  %vm1129_vm12 = vweird.f32 %v1123_v20 }
 0x241   : > { %v1117_v13 = vor.u32 1.1754944e-38, %v1116_v47  ;;  %vm1115_vm15 = vcmp.eq.f32.partialorder %v1114_v3, 8.507059e+37  ;;  %v3281_v3 = vld [vmem:[#allocation11_spill] sm:$0xff] }
 0x242   : > { %v1136_v51 = vor.u32 1.1754944e-38, %v1135_v50  ;;  %vm1134_vm0 = vcmp.eq.f32.partialorder %v1133_v22, 8.507059e+37  ;;  %v3280_v50 = vld [vmem:[#allocation10_spill] sm:$0xff] }
 0x243   : > { %v2254_v36 = vpop.eup %2253 }
 0x244   : > { %v1143_v57 = vadd.f32 1.0, %v2254_v36 }
 0x245   : > { %v2256_v63 = vpop.eup %2255 }
 0x246   : > { %v2258_v60 = vpop.eup %2257  ;;  %v1106_v6 = vmul.f32 %v2256_v63, %v1104_v19  ;;  %2259 = vrcp.f32 %v1143_v57  ;;  %vm1111_vm9 = vweird.f32 %v2256_v63  ;;  %vm1149_vm2 = vweird.f32 %v1143_v57 }
 0x247   : > { %v1125_v15 = vmul.f32 %v2258_v60, %v1123_v20  ;;  %2261 = vtanh.f32 %v1099_v33  ;;  %vm1130_vm10 = vweird.f32 %v2258_v60  ;;  %vm1112_vm13 = vmor %vm1110_vm11, %vm1111_vm9  ;;  %v1155_v33 = vand.u32 2147483648, %v1143_v57 }
 0x248   : > { %v1107_v5 = vsub.f32 1.0, %v1106_v6  ;;  %vm1131_vm14 = vmor %vm1129_vm12, %vm1130_vm10 }
 0x249   : > { %v1126_v7 = vsub.f32 1.0, %v1125_v15  ;;  %v1156_v15 = vor.u32 1.1754944e-38, %v1155_v33 }
 0x24a   : > { %v1108_v26 = vmul.f32 %v2256_v63, %v1107_v5 }
 0x24b   : > { %v1127_v46 = vmul.f32 %v2258_v60, %v1126_v7 }
 0x24c   : > { %v2260_v4 = vpop.eup %2259  ;;  %v1109_v21 = vadd.f32 %v2256_v63, %v1108_v26 }
 0x24d   : > { %v1128_v28 = vadd.f32 %v2258_v60, %v1127_v46  ;;  %v1145_v58 = vmul.f32 %v2260_v4, %v1143_v57  ;;  %v2262_v37 = vpop.eup %2261  ;;  %vm1150_vm1 = vweird.f32 %v2260_v4 }
 0x24e   : > { %v1113_v8 = vsel %vm1112_vm13, %v2256_v63, %v1109_v21  ;;  %v1153_v63 = vand.u32 2147483647, %v1143_v57  ;;  %vm1151_vm3 = vmor %vm1149_vm2, %vm1150_vm1 }
 0x24f   : > { %v1118_v55 = vsel %vm1115_vm15, %v1117_v13, %v1113_v8  ;;  %v1132_v43 = vsel %vm1131_vm14, %v2258_v60, %v1128_v28  ;;  %v1146_v59 = vsub.f32 1.0, %v1145_v58  ;;  %v3282_v28 = vld [vmem:[#allocation13_spill] sm:$0xff] }
 0x250   : > { %v1137_v40 = vsel %vm1134_vm0, %v1136_v51, %v1132_v43  ;;  %v1160_v41 = vmul.f32 %v2262_v37, %v1118_v55  ;;  %vm1154_vm4 = vcmp.eq.f32.partialorder %v1153_v63, 8.507059e+37  ;;  %v3283_v63 = vld [vmem:[#allocation12_spill] sm:$0xff] }
 0x251   : > { %v1159_v36 = vmul.f32 %v1137_v40, %v3004_v0  ;;  %v1147_v25 = vmul.f32 %v2260_v4, %v1146_v59 }
 0x253   : > { %v3044_v19 = vadd.f32 %v1160_v41, %v1159_v36  ;;  %v1148_v20 = vadd.f32 %v2260_v4, %v1147_v25 }
 0x255   : > { %2263 = vtanh.f32 %v3044_v19  ;;  %v1152_v6 = vsel %vm1151_vm3, %v2260_v4, %v1148_v20 }
 0x256   : > { %v1157_v5 = vsel %vm1154_vm4, %v1156_v15, %v1152_v6 }
 0x25b   : > { %v2264_v60 = vpop.eup %2263 }
 0x25c   : > { %v1163_v7 = vmul.f32 %v2264_v60, %v1157_v5 }
 0x25e   : > { %v1168_v47 = vpack.c.bf16 %v1163_v7, %v1163_v7 }
 0x260   : > { %1177 = vmatmul.bf16.vlgmr.msra.gmra.mxu0 %v1168_v47  ;;  %1190 = vmatmul.bf16.vlgmr.msra.gmra.mxu1 %v1168_v47 }
 0x261   : > { %1203 = vmatmul.bf16.vlgmr.msra.gmra.mxu2 %v1168_v47  ;;  %1216 = vmatmul.bf16.vlgmr.msra.gmra.mxu3 %v1168_v47 }
 0x262   : > { %1417 = vmatpush.bf16.msra.mxu0 %v2512_v10  ;;  %1430 = vmatpush.bf16.msra.mxu1 %v2514_v11 }
 0x263   : > { %1443 = vmatpush.bf16.msra.mxu2 %v2560_v27  ;;  %1456 = vmatpush.bf16.msra.mxu3 %v2524_v14 }
 0x266   : > { %1418 = vmatpush.bf16.msra.mxu0 %v2537_v18  ;;  %1431 = vmatpush.bf16.msra.mxu1 %v2550_v23 }
 0x267   : > { %1444 = vmatpush.bf16.msra.mxu2 %v2596_v39  ;;  %1457 = vmatpush.bf16.msra.mxu3 %v2552_v24 }
 0x26a   : > { %1419 = vmatpush.bf16.msra.mxu0 %v2582_v34  ;;  %1432 = vmatpush.bf16.msra.mxu1 %v2584_v35 }
 0x26b   : > { %1445 = vmatpush.bf16.msra.mxu2 %v2642_v53  ;;  %1458 = vmatpush.bf16.msra.mxu3 %v2594_v38 }
 0x26e   : > { %1420 = vmatpush.bf16.msra.mxu0 %v2628_v48  ;;  %1433 = vmatpush.bf16.msra.mxu1 %v2630_v49 }
 0x26f   : > { %1446 = vmatpush.bf16.msra.mxu2 %v2679_v2  ;;  %1459 = vmatpush.bf16.msra.mxu3 %v2640_v52 }
 0x272   : > { %1421 = vmatpush.bf16.msra.mxu0 %v2665_v61  ;;  %1434 = vmatpush.bf16.msra.mxu1 %v2667_v62 }
 0x273   : > { %1447 = vmatpush.bf16.msra.mxu2 %v2719_v17  ;;  %1460 = vmatpush.bf16.msra.mxu3 %v2677_v1 }
 0x276   : > { %1422 = vmatpush.bf16.msra.mxu0 %v2705_v9  ;;  %1435 = vmatpush.bf16.msra.mxu1 %v2707_v12 }
 0x277   : > { %1448 = vmatpush.bf16.msra.mxu2 %v2748_v31  ;;  %1461 = vmatpush.bf16.msra.mxu3 %v2717_v16 }
 0x27a   : > { %1423 = vmatpush.bf16.msra.mxu0 %v2742_v29  ;;  %1436 = vmatpush.bf16.msra.mxu1 %v2744_v30 }
 0x27b   : > { %1449 = vmatpush.bf16.msra.mxu2 %v2782_v45  ;;  %1462 = vmatpush.bf16.msra.mxu3 %v2750_v32 }
 0x27e   : > { %1424 = vmatpush.bf16.msra.mxu0 %v2773_v42  ;;  %1437 = vmatpush.bf16.msra.mxu1 %v2780_v44 }
 0x27f   : > { %1450 = vmatpush.bf16.msra.mxu2 %v2802_v56  ;;  %1463 = vmatpush.bf16.msra.mxu3 %v2796_v54 }
 0x2dd   : > { %v1178_v0 = vpop.f32.mrf.mxu0  ;;  %v1191_v57 = vpop.f32.mrf.mxu1 }
 0x2de   : > { %v1221_v26 = vadd.f32 %v1178_v0, %v3280_v50  ;;  %v1222_v46 = vadd.f32 %v1191_v57, %v3281_v3 }
 0x2e0   : > { %v2128_v22 = vmul.f32 -1.442695, %v1221_v26  ;;  %v2129_v4 = vmul.f32 -1.442695, %v1222_v46 }
 0x2e2   : > { %2265 = vpow2.f32 %v2128_v22 }
 0x2e3   : > { %2267 = vpow2.f32 %v2129_v4 }
 0x2e4   : > { %v1204_v21 = vpop.f32.mrf.mxu2  ;;  %v1217_v13 = vpop.f32.mrf.mxu3 }
 0x2e5   : > { %v1224_v58 = vadd.f32 %v1217_v13, %v3282_v28  ;;  %v1180_v51 = vpop.f32.mrf.mxu0  ;;  %v1193_v8 = vpop.f32.mrf.mxu1  ;;  %v1223_v6 = vadd.f32 %v1204_v21, %v3283_v63 }
 0x2e7   : > { %v2130_v37 = vmul.f32 -1.442695, %v1224_v58 }
 0x2e8   : > { %v2266_v55 = vpop.eup %2265 }
 0x2e9   : > { %v2268_v43 = vpop.eup %2267  ;;  %v1228_v59 = vadd.f32 1.0, %v2266_v55  ;;  %2269 = vpow2.f32 %v2130_v37 }
 0x2ea   : > { %v1247_v40 = vadd.f32 1.0, %v2268_v43 }
 0x2eb   : > { %2271 = vrcp.f32 %v1228_v59  ;;  %v1240_v0 = vand.u32 2147483648, %v1228_v59  ;;  %v1238_v26 = vand.u32 2147483647, %v1228_v59  ;;  %vm1234_vm7 = vweird.f32 %v1228_v59 }
 0x2ec   : > { %2273 = vrcp.f32 %v1247_v40  ;;  %v1206_v41 = vpop.f32.mrf.mxu2  ;;  %v1219_v36 = vpop.f32.mrf.mxu3  ;;  %v1259_v57 = vand.u32 2147483648, %v1247_v40  ;;  %v1257_v46 = vand.u32 2147483647, %v1247_v40  ;;  %vm1253_vm8 = vweird.f32 %v1247_v40 }
 0x2ed   : > { %v1241_v21 = vor.u32 1.1754944e-38, %v1240_v0  ;;  %vm1239_vm11 = vcmp.eq.f32.partialorder %v1238_v26, 8.507059e+37  ;;  %v3285_v26 = vld [vmem:[#allocation15_spill] sm:$0xff] }
 0x2ee   : > { %v1260_v58 = vor.u32 1.1754944e-38, %v1259_v57  ;;  %vm1258_vm12 = vcmp.eq.f32.partialorder %v1257_v46, 8.507059e+37  ;;  %v3284_v57 = vld [vmem:[#allocation14_spill] sm:$0xff] }
 0x2ef   : > { %v2270_v25 = vpop.eup %2269 }
 0x2f0   : > { %v1267_v20 = vadd.f32 1.0, %v2270_v25 }
 0x2f1   : > { %v2272_v33 = vpop.eup %2271 }
 0x2f2   : > { %v2274_v15 = vpop.eup %2273  ;;  %v1230_v60 = vmul.f32 %v2272_v33, %v1228_v59  ;;  %2275 = vrcp.f32 %v1267_v20  ;;  %vm1235_vm5 = vweird.f32 %v2272_v33  ;;  %vm1273_vm14 = vweird.f32 %v1267_v20 }
 0x2f3   : > { %v1249_v5 = vmul.f32 %v2274_v15, %v1247_v40  ;;  %2277 = vtanh.f32 %v1223_v6  ;;  %vm1254_vm6 = vweird.f32 %v2274_v15  ;;  %vm1236_vm9 = vmor %vm1234_vm7, %vm1235_vm5  ;;  %v1279_v6 = vand.u32 2147483648, %v1267_v20 }
 0x2f4   : > { %v1231_v7 = vsub.f32 1.0, %v1230_v60  ;;  %vm1255_vm10 = vmor %vm1253_vm8, %vm1254_vm6 }
 0x2f5   : > { %v1250_v47 = vsub.f32 1.0, %v1249_v5  ;;  %v1280_v5 = vor.u32 1.1754944e-38, %v1279_v6 }
 0x2f6   : > { %v1232_v50 = vmul.f32 %v2272_v33, %v1231_v7 }
 0x2f7   : > { %v1251_v3 = vmul.f32 %v2274_v15, %v1250_v47 }
 0x2f8   : > { %v2276_v22 = vpop.eup %2275  ;;  %v1233_v4 = vadd.f32 %v2272_v33, %v1232_v50 }
 0x2f9   : > { %v1252_v13 = vadd.f32 %v2274_v15, %v1251_v3  ;;  %v1269_v28 = vmul.f32 %v2276_v22, %v1267_v20  ;;  %v2278_v8 = vpop.eup %2277  ;;  %vm1274_vm13 = vweird.f32 %v2276_v22 }
 0x2fa   : > { %v1237_v51 = vsel %vm1236_vm9, %v2272_v33, %v1233_v4  ;;  %v1277_v33 = vand.u32 2147483647, %v1267_v20  ;;  %vm1275_vm15 = vmor %vm1273_vm14, %vm1274_vm13 }
 0x2fb   : > { %v1242_v37 = vsel %vm1239_vm11, %v1241_v21, %v1237_v51  ;;  %v1256_v55 = vsel %vm1255_vm10, %v2274_v15, %v1252_v13  ;;  %v1270_v43 = vsub.f32 1.0, %v1269_v28  ;;  %v3286_v13 = vld [vmem:[#allocation17_spill] sm:$0xff] }
 0x2fc   : > { %v1261_v41 = vsel %vm1258_vm12, %v1260_v58, %v1256_v55  ;;  %v1284_v36 = vmul.f32 %v2278_v8, %v1242_v37  ;;  %vm1278_vm0 = vcmp.eq.f32.partialorder %v1277_v33, 8.507059e+37  ;;  %v3287_v33 = vld [vmem:[#allocation16_spill] sm:$0xff] }
 0x2fd   : > { %v1283_v25 = vmul.f32 %v1261_v41, %v3044_v19  ;;  %v1271_v63 = vmul.f32 %v2276_v22, %v1270_v43 }
 0x2ff   : > { %v3084_v59 = vadd.f32 %v1284_v36, %v1283_v25  ;;  %v1272_v40 = vadd.f32 %v2276_v22, %v1271_v63 }
 0x301   : > { %2279 = vtanh.f32 %v3084_v59  ;;  %v1276_v60 = vsel %vm1275_vm15, %v2276_v22, %v1272_v40 }
 0x302   : > { %v1281_v7 = vsel %vm1278_vm0, %v1280_v5, %v1276_v60 }
 0x307   : > { %v2280_v15 = vpop.eup %2279 }
 0x308   : > { %v1287_v47 = vmul.f32 %v2280_v15, %v1281_v7 }
 0x30a   : > { %v1292_v0 = vpack.c.bf16 %v1287_v47, %v1287_v47 }
 0x30c   : > { %1301 = vmatmul.bf16.vlgmr.msrb.gmra.mxu0 %v1292_v0  ;;  %1314 = vmatmul.bf16.vlgmr.msrb.gmra.mxu1 %v1292_v0 }
 0x30d   : > { %1327 = vmatmul.bf16.vlgmr.msrb.gmra.mxu2 %v1292_v0  ;;  %1340 = vmatmul.bf16.vlgmr.msrb.gmra.mxu3 %v1292_v0 }
 0x30e   : > { %1541 = vmatpush.bf16.msrb.mxu0 %v2512_v10  ;;  %1554 = vmatpush.bf16.msrb.mxu1 %v2514_v11 }
 0x30f   : > { %1567 = vmatpush.bf16.msrb.mxu2 %v2560_v27  ;;  %1580 = vmatpush.bf16.msrb.mxu3 %v2524_v14 }
 0x312   : > { %1542 = vmatpush.bf16.msrb.mxu0 %v2537_v18  ;;  %1555 = vmatpush.bf16.msrb.mxu1 %v2550_v23 }
 0x313   : > { %1568 = vmatpush.bf16.msrb.mxu2 %v2596_v39  ;;  %1581 = vmatpush.bf16.msrb.mxu3 %v2552_v24 }
 0x316   : > { %1543 = vmatpush.bf16.msrb.mxu0 %v2582_v34  ;;  %1556 = vmatpush.bf16.msrb.mxu1 %v2584_v35 }
 0x317   : > { %1569 = vmatpush.bf16.msrb.mxu2 %v2642_v53  ;;  %1582 = vmatpush.bf16.msrb.mxu3 %v2594_v38 }
 0x31a   : > { %1544 = vmatpush.bf16.msrb.mxu0 %v2628_v48  ;;  %1557 = vmatpush.bf16.msrb.mxu1 %v2630_v49 }
 0x31b   : > { %1570 = vmatpush.bf16.msrb.mxu2 %v2679_v2  ;;  %1583 = vmatpush.bf16.msrb.mxu3 %v2640_v52 }
 0x31e   : > { %1545 = vmatpush.bf16.msrb.mxu0 %v2665_v61  ;;  %1558 = vmatpush.bf16.msrb.mxu1 %v2667_v62 }
 0x31f   : > { %1571 = vmatpush.bf16.msrb.mxu2 %v2719_v17  ;;  %1584 = vmatpush.bf16.msrb.mxu3 %v2677_v1 }
 0x322   : > { %1546 = vmatpush.bf16.msrb.mxu0 %v2705_v9  ;;  %1559 = vmatpush.bf16.msrb.mxu1 %v2707_v12 }
 0x323   : > { %1572 = vmatpush.bf16.msrb.mxu2 %v2748_v31  ;;  %1585 = vmatpush.bf16.msrb.mxu3 %v2717_v16 }
 0x326   : > { %1547 = vmatpush.bf16.msrb.mxu0 %v2742_v29  ;;  %1560 = vmatpush.bf16.msrb.mxu1 %v2744_v30 }
 0x327   : > { %1573 = vmatpush.bf16.msrb.mxu2 %v2782_v45  ;;  %1586 = vmatpush.bf16.msrb.mxu3 %v2750_v32 }
 0x32a   : > { %1548 = vmatpush.bf16.msrb.mxu0 %v2773_v42  ;;  %1561 = vmatpush.bf16.msrb.mxu1 %v2780_v44 }
 0x32b   : > { %1574 = vmatpush.bf16.msrb.mxu2 %v2802_v56  ;;  %1587 = vmatpush.bf16.msrb.mxu3 %v2796_v54 }
 0x389   : > { %v1302_v19 = vpop.f32.mrf.mxu0  ;;  %v1315_v20 = vpop.f32.mrf.mxu1 }
 0x38a   : > { %v1345_v50 = vadd.f32 %v1302_v19, %v3284_v57  ;;  %v1346_v3 = vadd.f32 %v1315_v20, %v3285_v26 }
 0x38c   : > { %v2131_v46 = vmul.f32 -1.442695, %v1345_v50  ;;  %v2132_v22 = vmul.f32 -1.442695, %v1346_v3 }
 0x38e   : > { %2281 = vpow2.f32 %v2131_v46 }
 0x38f   : > { %2283 = vpow2.f32 %v2132_v22 }
 0x390   : > { %v1328_v4 = vpop.f32.mrf.mxu2  ;;  %v1341_v21 = vpop.f32.mrf.mxu3 }
 0x391   : > { %v1348_v28 = vadd.f32 %v1341_v21, %v3286_v13  ;;  %v1304_v58 = vpop.f32.mrf.mxu0  ;;  %v1317_v51 = vpop.f32.mrf.mxu1  ;;  %v1347_v60 = vadd.f32 %v1328_v4, %v3287_v33 }
 0x393   : > { %v2133_v8 = vmul.f32 -1.442695, %v1348_v28 }
 0x394   : > { %v2282_v37 = vpop.eup %2281 }
 0x395   : > { %v2284_v55 = vpop.eup %2283  ;;  %v1352_v43 = vadd.f32 1.0, %v2282_v37  ;;  %2285 = vpow2.f32 %v2133_v8 }
 0x396   : > { %v1371_v41 = vadd.f32 1.0, %v2284_v55 }
 0x397   : > { %2287 = vrcp.f32 %v1352_v43  ;;  %v1364_v19 = vand.u32 2147483648, %v1352_v43  ;;  %v1362_v50 = vand.u32 2147483647, %v1352_v43  ;;  %vm1358_vm3 = vweird.f32 %v1352_v43 }
 0x398   : > { %2289 = vrcp.f32 %v1371_v41  ;;  %v1330_v36 = vpop.f32.mrf.mxu2  ;;  %v1343_v25 = vpop.f32.mrf.mxu3  ;;  %v1383_v20 = vand.u32 2147483648, %v1371_v41  ;;  %v1381_v3 = vand.u32 2147483647, %v1371_v41  ;;  %vm1377_vm4 = vweird.f32 %v1371_v41 }
 0x399   : > { %v1365_v4 = vor.u32 1.1754944e-38, %v1364_v19  ;;  %vm1363_vm7 = vcmp.eq.f32.partialorder %v1362_v50, 8.507059e+37 }
 0x39a   : > { %v1384_v28 = vor.u32 1.1754944e-38, %v1383_v20  ;;  %vm1382_vm8 = vcmp.eq.f32.partialorder %v1381_v3, 8.507059e+37 }
 0x39b   : > { %v2286_v63 = vpop.eup %2285 }
 0x39c   : > { %v1391_v40 = vadd.f32 1.0, %v2286_v63 }
 0x39d   : > { %v2288_v6 = vpop.eup %2287 }
 0x39e   : > { %v2290_v5 = vpop.eup %2289  ;;  %v1354_v15 = vmul.f32 %v2288_v6, %v1352_v43  ;;  %2291 = vrcp.f32 %v1391_v40  ;;  %vm1359_vm1 = vweird.f32 %v2288_v6  ;;  %vm1397_vm10 = vweird.f32 %v1391_v40 }
 0x39f   : > { %v1373_v7 = vmul.f32 %v2290_v5, %v1371_v41  ;;  %2293 = vtanh.f32 %v1347_v60  ;;  %vm1378_vm2 = vweird.f32 %v2290_v5  ;;  %vm1360_vm5 = vmor %vm1358_vm3, %vm1359_vm1  ;;  %v1403_v60 = vand.u32 2147483648, %v1391_v40 }
 0x3a0   : > { %v1355_v47 = vsub.f32 1.0, %v1354_v15  ;;  %vm1379_vm6 = vmor %vm1377_vm4, %vm1378_vm2 }
 0x3a1   : > { %v1374_v0 = vsub.f32 1.0, %v1373_v7  ;;  %v1404_v7 = vor.u32 1.1754944e-38, %v1403_v60 }
 0x3a2   : > { %v1356_v57 = vmul.f32 %v2288_v6, %v1355_v47 }
 0x3a3   : > { %v1375_v26 = vmul.f32 %v2290_v5, %v1374_v0 }
 0x3a4   : > { %v2292_v46 = vpop.eup %2291  ;;  %v1357_v22 = vadd.f32 %v2288_v6, %v1356_v57 }
 0x3a5   : > { %v1376_v21 = vadd.f32 %v2290_v5, %v1375_v26  ;;  %v1393_v13 = vmul.f32 %v2292_v46, %v1391_v40  ;;  %v2294_v51 = vpop.eup %2293  ;;  %vm1398_vm9 = vweird.f32 %v2292_v46 }
 0x3a6   : > { %v1361_v58 = vsel %vm1360_vm5, %v2288_v6, %v1357_v22  ;;  %v1401_v6 = vand.u32 2147483647, %v1391_v40  ;;  %vm1399_vm11 = vmor %vm1397_vm10, %vm1398_vm9 }
 0x3a7   : > { %v1366_v8 = vsel %vm1363_vm7, %v1365_v4, %v1361_v58  ;;  %v1380_v37 = vsel %vm1379_vm6, %v2290_v5, %v1376_v21  ;;  %v1394_v55 = vsub.f32 1.0, %v1393_v13 }
 0x3a8   : > { %v1385_v36 = vsel %vm1382_vm8, %v1384_v28, %v1380_v37  ;;  %v1408_v25 = vmul.f32 %v2294_v51, %v1366_v8  ;;  %vm1402_vm12 = vcmp.eq.f32.partialorder %v1401_v6, 8.507059e+37 }
 0x3a9   : > { %v1407_v63 = vmul.f32 %v1385_v36, %v3084_v59  ;;  %v1395_v33 = vmul.f32 %v2292_v46, %v1394_v55 }
 0x3ab   : > { %v3124_v43 = vadd.f32 %v1408_v25, %v1407_v63  ;;  %v1396_v41 = vadd.f32 %v2292_v46, %v1395_v33 }
 0x3ad   : > { %2295 = vtanh.f32 %v3124_v43  ;;  %v1400_v15 = vsel %vm1399_vm11, %v2292_v46, %v1396_v41 }
 0x3ae   : > { %v1405_v47 = vsel %vm1402_vm12, %v1404_v7, %v1400_v15 }
 0x3b3   : > { %v2296_v5 = vpop.eup %2295 }
 0x3b4   : > { %v1411_v0 = vmul.f32 %v2296_v5, %v1405_v47 }
 0x3b6   : > { %v1416_v19 = vpack.c.bf16 %v1411_v0, %v1411_v0 }
 0x3b8   : > { %1425 = vmatmul.bf16.vlgmr.msra.gmra.mxu0 %v1416_v19  ;;  %1438 = vmatmul.bf16.vlgmr.msra.gmra.mxu1 %v1416_v19 }
 0x3b9   : > { %1451 = vmatmul.bf16.vlgmr.msra.gmra.mxu2 %v1416_v19  ;;  %1464 = vmatmul.bf16.vlgmr.msra.gmra.mxu3 %v1416_v19 }
 0x3ba   : > { %1665 = vmatpush.bf16.msra.mxu0 %v2512_v10  ;;  %1678 = vmatpush.bf16.msra.mxu1 %v2514_v11 }
 0x3bb   : > { %1691 = vmatpush.bf16.msra.mxu2 %v2560_v27  ;;  %1704 = vmatpush.bf16.msra.mxu3 %v2524_v14  ;;  %v3288_v14 = vld [vmem:[#allocation18_spill] sm:$0xff] }
 0x3be   : > { %1666 = vmatpush.bf16.msra.mxu0 %v2537_v18  ;;  %1679 = vmatpush.bf16.msra.mxu1 %v2550_v23  ;;  %v3289_v23 = vld [vmem:[#allocation19_spill] sm:$0xff] }
 0x3bf   : > { %1692 = vmatpush.bf16.msra.mxu2 %v2596_v39  ;;  %1705 = vmatpush.bf16.msra.mxu3 %v2552_v24  ;;  %v3290_v39 = vld [vmem:[#allocation21_spill] sm:$0xff] }
 0x3c2   : > { %1667 = vmatpush.bf16.msra.mxu0 %v2582_v34  ;;  %1680 = vmatpush.bf16.msra.mxu1 %v2584_v35 }
 0x3c3   : > { %1693 = vmatpush.bf16.msra.mxu2 %v2642_v53  ;;  %1706 = vmatpush.bf16.msra.mxu3 %v2594_v38 }
 0x3c6   : > { %1668 = vmatpush.bf16.msra.mxu0 %v2628_v48  ;;  %1681 = vmatpush.bf16.msra.mxu1 %v2630_v49 }
 0x3c7   : > { %1694 = vmatpush.bf16.msra.mxu2 %v2679_v2  ;;  %1707 = vmatpush.bf16.msra.mxu3 %v2640_v52 }
 0x3ca   : > { %1669 = vmatpush.bf16.msra.mxu0 %v2665_v61  ;;  %1682 = vmatpush.bf16.msra.mxu1 %v2667_v62 }
 0x3cb   : > { %1695 = vmatpush.bf16.msra.mxu2 %v2719_v17  ;;  %1708 = vmatpush.bf16.msra.mxu3 %v2677_v1 }
 0x3ce   : > { %1670 = vmatpush.bf16.msra.mxu0 %v2705_v9  ;;  %1683 = vmatpush.bf16.msra.mxu1 %v2707_v12 }
 0x3cf   : > { %1696 = vmatpush.bf16.msra.mxu2 %v2748_v31  ;;  %1709 = vmatpush.bf16.msra.mxu3 %v2717_v16 }
 0x3d2   : > { %1671 = vmatpush.bf16.msra.mxu0 %v2742_v29  ;;  %1684 = vmatpush.bf16.msra.mxu1 %v2744_v30  ;;  %v3291_v30 = vld [vmem:[#allocation20_spill] sm:$0xff] }
 0x3d3   : > { %1697 = vmatpush.bf16.msra.mxu2 %v2782_v45  ;;  %1710 = vmatpush.bf16.msra.mxu3 %v2750_v32 }
 0x3d6   : > { %1672 = vmatpush.bf16.msra.mxu0 %v2773_v42  ;;  %1685 = vmatpush.bf16.msra.mxu1 %v2780_v44 }
 0x3d7   : > { %1698 = vmatpush.bf16.msra.mxu2 %v2802_v56  ;;  %1711 = vmatpush.bf16.msra.mxu3 %v2796_v54 }
 0x435   : > { %v1426_v10 = vpop.f32.mrf.mxu0  ;;  %v1439_v11 = vpop.f32.mrf.mxu1 }
 0x436   : > { %v1469_v18 = vadd.f32 %v1426_v10, %v3288_v14  ;;  %v1470_v24 = vadd.f32 %v1439_v11, %v3289_v23  ;;  %v3292_v10 = vld [vmem:[#allocation22_spill] sm:$0xff]  ;;  %v3293_v14 = vld [vmem:[#allocation23_spill] sm:$0xff] }
 0x438   : > { %v2134_v27 = vmul.f32 -1.442695, %v1469_v18  ;;  %v2135_v34 = vmul.f32 -1.442695, %v1470_v24 }
 0x43a   : > { %2297 = vpow2.f32 %v2134_v27 }
 0x43b   : > { %2299 = vpow2.f32 %v2135_v34 }
 0x43c   : > { %v1452_v35 = vpop.f32.mrf.mxu2  ;;  %v1465_v38 = vpop.f32.mrf.mxu3 }
 0x43d   : > { %v1472_v48 = vadd.f32 %v1465_v38, %v3290_v39  ;;  %v1428_v49 = vpop.f32.mrf.mxu0  ;;  %v1441_v52 = vpop.f32.mrf.mxu1  ;;  %v1471_v31 = vadd.f32 %v1452_v35, %v3291_v30  ;;  %v3294_v35 = vld [vmem:[#allocation25_spill] sm:$0xff] }
 0x43f   : > { %v2136_v53 = vmul.f32 -1.442695, %v1472_v48 }
 0x440   : > { %v2298_v61 = vpop.eup %2297 }
 0x441   : > { %v2300_v62 = vpop.eup %2299  ;;  %v1476_v1 = vadd.f32 1.0, %v2298_v61  ;;  %2301 = vpow2.f32 %v2136_v53 }
 0x442   : > { %v1495_v2 = vadd.f32 1.0, %v2300_v62 }
 0x443   : > { %2303 = vrcp.f32 %v1476_v1  ;;  %v1488_v56 = vand.u32 2147483648, %v1476_v1  ;;  %v1486_v20 = vand.u32 2147483647, %v1476_v1  ;;  %vm1482_vm15 = vweird.f32 %v1476_v1 }
 0x444   : > { %2305 = vrcp.f32 %v1495_v2  ;;  %v1454_v9 = vpop.f32.mrf.mxu2  ;;  %v1467_v12 = vpop.f32.mrf.mxu3  ;;  %v1507_v59 = vand.u32 2147483648, %v1495_v2  ;;  %v1505_v50 = vand.u32 2147483647, %v1495_v2  ;;  %vm1501_vm0 = vweird.f32 %v1495_v2 }
 0x445   : > { %v1489_v46 = vor.u32 1.1754944e-38, %v1488_v56  ;;  %vm1487_vm3 = vcmp.eq.f32.partialorder %v1486_v20, 8.507059e+37 }
 0x446   : > { %v1508_v21 = vor.u32 1.1754944e-38, %v1507_v59  ;;  %vm1506_vm4 = vcmp.eq.f32.partialorder %v1505_v50, 8.507059e+37 }
 0x447   : > { %v2302_v16 = vpop.eup %2301 }
 0x448   : > { %v1515_v17 = vadd.f32 1.0, %v2302_v16 }
 0x449   : > { %v2304_v29 = vpop.eup %2303 }
 0x44a   : > { %v2306_v32 = vpop.eup %2305  ;;  %v1478_v42 = vmul.f32 %v2304_v29, %v1476_v1  ;;  %2307 = vrcp.f32 %v1515_v17  ;;  %vm1483_vm13 = vweird.f32 %v2304_v29  ;;  %v1527_v41 = vand.u32 2147483648, %v1515_v17 }
 0x44b   : > { %v1497_v44 = vmul.f32 %v2306_v32, %v1495_v2  ;;  %2309 = vtanh.f32 %v1471_v31  ;;  %vm1502_vm14 = vweird.f32 %v2306_v32  ;;  %vm1484_vm1 = vmor %vm1482_vm15, %vm1483_vm13  ;;  %vm1521_vm6 = vweird.f32 %v1515_v17 }
 0x44c   : > { %v1479_v45 = vsub.f32 1.0, %v1478_v42  ;;  %vm1503_vm2 = vmor %vm1501_vm0, %vm1502_vm14  ;;  %v1525_v60 = vand.u32 2147483647, %v1515_v17  ;;  %v1528_v15 = vor.u32 1.1754944e-38, %v1527_v41 }
 0x44d   : > { %v1498_v54 = vsub.f32 1.0, %v1497_v44 }
 0x44e   : > { %v1480_v40 = vmul.f32 %v2304_v29, %v1479_v45  ;;  %vm1526_vm8 = vcmp.eq.f32.partialorder %v1525_v60, 8.507059e+37 }
 0x44f   : > { %v1499_v57 = vmul.f32 %v2306_v32, %v1498_v54 }
 0x450   : > { %v2308_v26 = vpop.eup %2307  ;;  %v1481_v3 = vadd.f32 %v2304_v29, %v1480_v40 }
 0x451   : > { %v1500_v22 = vadd.f32 %v2306_v32, %v1499_v57  ;;  %v1517_v4 = vmul.f32 %v2308_v26, %v1515_v17  ;;  %v2310_v28 = vpop.eup %2309  ;;  %vm1522_vm5 = vweird.f32 %v2308_v26  ;;  %v3295_v17 = vld [vmem:[#allocation24_spill] sm:$0xff] }
 0x452   : > { %v1485_v13 = vsel %vm1484_vm1, %v2304_v29, %v1481_v3  ;;  %vm1523_vm7 = vmor %vm1521_vm6, %vm1522_vm5 }
 0x453   : > { %v1490_v58 = vsel %vm1487_vm3, %v1489_v46, %v1485_v13  ;;  %v1504_v51 = vsel %vm1503_vm2, %v2306_v32, %v1500_v22  ;;  %v1518_v8 = vsub.f32 1.0, %v1517_v4 }
 0x454   : > { %v1509_v37 = vsel %vm1506_vm4, %v1508_v21, %v1504_v51  ;;  %v1532_v55 = vmul.f32 %v2310_v28, %v1490_v58 }
 0x455   : > { %v1531_v36 = vmul.f32 %v1509_v37, %v3124_v43  ;;  %v1519_v25 = vmul.f32 %v2308_v26, %v1518_v8 }
 0x457   : > { %v3164_v63 = vadd.f32 %v1532_v55, %v1531_v36  ;;  %v1520_v33 = vadd.f32 %v2308_v26, %v1519_v25 }
 0x459   : > { %2311 = vtanh.f32 %v3164_v63  ;;  %v1524_v6 = vsel %vm1523_vm7, %v2308_v26, %v1520_v33 }
 0x45a   : > { %v1529_v5 = vsel %vm1526_vm8, %v1528_v15, %v1524_v6 }
 0x45f   : > { %v2312_v7 = vpop.eup %2311 }
 0x460   : > { %v1535_v47 = vmul.f32 %v2312_v7, %v1529_v5 }
 0x462   : > { %v1540_v0 = vpack.c.bf16 %v1535_v47, %v1535_v47 }
 0x464   : > { %1549 = vmatmul.bf16.vlgmr.msrb.gmra.mxu0 %v1540_v0  ;;  %1562 = vmatmul.bf16.vlgmr.msrb.gmra.mxu1 %v1540_v0 }
 0x465   : > { %1575 = vmatmul.bf16.vlgmr.msrb.gmra.mxu2 %v1540_v0  ;;  %1588 = vmatmul.bf16.vlgmr.msrb.gmra.mxu3 %v1540_v0 }
 0x4e1   : > { %v1550_v43 = vpop.f32.mrf.mxu0  ;;  %v1563_v19 = vpop.f32.mrf.mxu1 }
 0x4e2   : > { %v1593_v11 = vadd.f32 %v1550_v43, %v3292_v10  ;;  %v1594_v18 = vadd.f32 %v1563_v19, %v3293_v14  ;;  %v3296_v43 = vld [vmem:[#allocation26_spill] sm:$0xff]  ;;  %v3297_v10 = vld [vmem:[#allocation27_spill] sm:$0xff] }
 0x4e4   : > { %v2137_v23 = vmul.f32 -1.442695, %v1593_v11  ;;  %v2138_v24 = vmul.f32 -1.442695, %v1594_v18 }
 0x4e6   : > { %2313 = vpow2.f32 %v2137_v23 }
 0x4e7   : > { %2315 = vpow2.f32 %v2138_v24 }
 0x4e8   : > { %v1576_v27 = vpop.f32.mrf.mxu2  ;;  %v1589_v34 = vpop.f32.mrf.mxu3 }
 0x4e9   : > { %v1596_v38 = vadd.f32 %v1589_v34, %v3294_v35  ;;  %v1552_v39 = vpop.f32.mrf.mxu0  ;;  %v1565_v48 = vpop.f32.mrf.mxu1  ;;  %v1595_v29 = vadd.f32 %v1576_v27, %v3295_v17  ;;  %v3298_v27 = vld [vmem:[#allocation29_spill] sm:$0xff] }
 0x4eb   : > { %v2139_v49 = vmul.f32 -1.442695, %v1596_v38 }
 0x4ec   : > { %v2314_v52 = vpop.eup %2313 }
 0x4ed   : > { %v2316_v53 = vpop.eup %2315  ;;  %v1600_v61 = vadd.f32 1.0, %v2314_v52  ;;  %2317 = vpow2.f32 %v2139_v49 }
 0x4ee   : > { %v1619_v62 = vadd.f32 1.0, %v2316_v53 }
 0x4ef   : > { %2319 = vrcp.f32 %v1600_v61  ;;  %v1612_v45 = vand.u32 2147483648, %v1600_v61  ;;  %v1610_v59 = vand.u32 2147483647, %v1600_v61  ;;  %vm1606_vm11 = vweird.f32 %v1600_v61 }
 0x4f0   : > { %2321 = vrcp.f32 %v1619_v62  ;;  %v1578_v1 = vpop.f32.mrf.mxu2  ;;  %v1591_v2 = vpop.f32.mrf.mxu3  ;;  %v1631_v54 = vand.u32 2147483648, %v1619_v62  ;;  %v1629_v20 = vand.u32 2147483647, %v1619_v62  ;;  %vm1625_vm12 = vweird.f32 %v1619_v62 }
 0x4f1   : > { %v1613_v26 = vor.u32 1.1754944e-38, %v1612_v45  ;;  %vm1611_vm15 = vcmp.eq.f32.partialorder %v1610_v59, 8.507059e+37 }
 0x4f2   : > { %v1632_v22 = vor.u32 1.1754944e-38, %v1631_v54  ;;  %vm1630_vm0 = vcmp.eq.f32.partialorder %v1629_v20, 8.507059e+37 }
 0x4f3   : > { %v2318_v9 = vpop.eup %2317 }
 0x4f4   : > { %v1639_v12 = vadd.f32 1.0, %v2318_v9 }
 0x4f5   : > { %v2320_v16 = vpop.eup %2319 }
 0x4f6   : > { %v2322_v30 = vpop.eup %2321  ;;  %v1602_v31 = vmul.f32 %v2320_v16, %v1600_v61  ;;  %2323 = vrcp.f32 %v1639_v12  ;;  %vm1607_vm9 = vweird.f32 %v2320_v16  ;;  %v1651_v33 = vand.u32 2147483648, %v1639_v12 }
 0x4f7   : > { %v1621_v32 = vmul.f32 %v2322_v30, %v1619_v62  ;;  %2325 = vtanh.f32 %v1595_v29  ;;  %vm1626_vm10 = vweird.f32 %v2322_v30  ;;  %vm1608_vm13 = vmor %vm1606_vm11, %vm1607_vm9  ;;  %vm1645_vm2 = vweird.f32 %v1639_v12 }
 0x4f8   : > { %v1603_v42 = vsub.f32 1.0, %v1602_v31  ;;  %vm1627_vm14 = vmor %vm1625_vm12, %vm1626_vm10  ;;  %v1649_v41 = vand.u32 2147483647, %v1639_v12  ;;  %v1652_v6 = vor.u32 1.1754944e-38, %v1651_v33 }
 0x4f9   : > { %v1622_v44 = vsub.f32 1.0, %v1621_v32 }
 0x4fa   : > { %v1604_v56 = vmul.f32 %v2320_v16, %v1603_v42  ;;  %vm1650_vm4 = vcmp.eq.f32.partialorder %v1649_v41, 8.507059e+37 }
 0x4fb   : > { %v1623_v40 = vmul.f32 %v2322_v30, %v1622_v44 }
 0x4fc   : > { %v2324_v57 = vpop.eup %2323  ;;  %v1605_v50 = vadd.f32 %v2320_v16, %v1604_v56 }
 0x4fd   : > { %v1624_v3 = vadd.f32 %v2322_v30, %v1623_v40  ;;  %v1641_v46 = vmul.f32 %v2324_v57, %v1639_v12  ;;  %v2326_v21 = vpop.eup %2325  ;;  %vm1646_vm1 = vweird.f32 %v2324_v57  ;;  %v3299_v12 = vld [vmem:[#allocation28_spill] sm:$0xff] }
 0x4fe   : > { %v1609_v4 = vsel %vm1608_vm13, %v2320_v16, %v1605_v50  ;;  %vm1647_vm3 = vmor %vm1645_vm2, %vm1646_vm1 }
 0x4ff   : > { %v1614_v13 = vsel %vm1611_vm15, %v1613_v26, %v1609_v4  ;;  %v1628_v28 = vsel %vm1627_vm14, %v2322_v30, %v1624_v3  ;;  %v1642_v58 = vsub.f32 1.0, %v1641_v46 }
 0x500   : > { %v1633_v51 = vsel %vm1630_vm0, %v1632_v22, %v1628_v28  ;;  %v1656_v8 = vmul.f32 %v2326_v21, %v1614_v13 }
 0x501   : > { %v1655_v37 = vmul.f32 %v1633_v51, %v3164_v63  ;;  %v1643_v55 = vmul.f32 %v2324_v57, %v1642_v58 }
 0x503   : > { %v3172_v36 = vadd.f32 %v1656_v8, %v1655_v37  ;;  %v1644_v25 = vadd.f32 %v2324_v57, %v1643_v55 }
 0x505   : > { %2327 = vtanh.f32 %v3172_v36  ;;  %v1648_v60 = vsel %vm1647_vm3, %v2324_v57, %v1644_v25 }
 0x506   : > { %v1653_v7 = vsel %vm1650_vm4, %v1652_v6, %v1648_v60 }
 0x50b   : > { %v2328_v15 = vpop.eup %2327 }
 0x50c   : > { %v1659_v5 = vmul.f32 %v2328_v15, %v1653_v7 }
 0x50e   : > { %v1664_v47 = vpack.c.bf16 %v1659_v5, %v1659_v5 }
 0x510   : > { %1673 = vmatmul.bf16.vlgmr.msra.gmra.mxu0 %v1664_v47  ;;  %1686 = vmatmul.bf16.vlgmr.msra.gmra.mxu1 %v1664_v47 }
 0x511   : > { %1699 = vmatmul.bf16.vlgmr.msra.gmra.mxu2 %v1664_v47  ;;  %1712 = vmatmul.bf16.vlgmr.msra.gmra.mxu3 %v1664_v47 }
 0x58d   : > { %v1674_v63 = vpop.f32.mrf.mxu0  ;;  %v1687_v0 = vpop.f32.mrf.mxu1 }
 0x58e   : > { %v1717_v19 = vadd.f32 %v1674_v63, %v3296_v43  ;;  %v1718_v11 = vadd.f32 %v1687_v0, %v3297_v10 }
 0x590   : > { %v2140_v14 = vmul.f32 -1.442695, %v1717_v19  ;;  %v2141_v18 = vmul.f32 -1.442695, %v1718_v11 }
 0x592   : > { %2329 = vpow2.f32 %v2140_v14 }
 0x593   : > { %2331 = vpow2.f32 %v2141_v18 }
 0x594   : > { %v1700_v23 = vpop.f32.mrf.mxu2  ;;  %v1713_v24 = vpop.f32.mrf.mxu3 }
 0x595   : > { %v1720_v34 = vadd.f32 %v1713_v24, %v3298_v27  ;;  %v1676_v35 = vpop.f32.mrf.mxu0  ;;  %v1689_v38 = vpop.f32.mrf.mxu1  ;;  %v1719_v16 = vadd.f32 %v1700_v23, %v3299_v12 }
 0x597   : > { %v2142_v39 = vmul.f32 -1.442695, %v1720_v34 }
 0x598   : > { %v2330_v48 = vpop.eup %2329 }
 0x599   : > { %v2332_v49 = vpop.eup %2331  ;;  %v1724_v52 = vadd.f32 1.0, %v2330_v48  ;;  %2333 = vpow2.f32 %v2142_v39 }
 0x59a   : > { %v1743_v53 = vadd.f32 1.0, %v2332_v49 }
 0x59b   : > { %2335 = vrcp.f32 %v1724_v52  ;;  %v1736_v42 = vand.u32 2147483648, %v1724_v52  ;;  %v1734_v54 = vand.u32 2147483647, %v1724_v52  ;;  %vm1730_vm7 = vweird.f32 %v1724_v52 }
 0x59c   : > { %2337 = vrcp.f32 %v1743_v53  ;;  %v1702_v61 = vpop.f32.mrf.mxu2  ;;  %v1715_v62 = vpop.f32.mrf.mxu3  ;;  %v1755_v44 = vand.u32 2147483648, %v1743_v53  ;;  %v1753_v59 = vand.u32 2147483647, %v1743_v53  ;;  %vm1749_vm8 = vweird.f32 %v1743_v53 }
 0x59d   : > { %v1737_v57 = vor.u32 1.1754944e-38, %v1736_v42  ;;  %vm1735_vm11 = vcmp.eq.f32.partialorder %v1734_v54, 8.507059e+37 }
 0x59e   : > { %v1756_v3 = vor.u32 1.1754944e-38, %v1755_v44  ;;  %vm1754_vm12 = vcmp.eq.f32.partialorder %v1753_v59, 8.507059e+37 }
 0x59f   : > { %v2334_v1 = vpop.eup %2333 }
 0x5a0   : > { %v1763_v2 = vadd.f32 1.0, %v2334_v1 }
 0x5a1   : > { %v2336_v9 = vpop.eup %2335 }
 0x5a2   : > { %v2338_v17 = vpop.eup %2337  ;;  %v1726_v29 = vmul.f32 %v2336_v9, %v1724_v52  ;;  %2339 = vrcp.f32 %v1763_v2  ;;  %vm1731_vm5 = vweird.f32 %v2336_v9  ;;  %v1775_v25 = vand.u32 2147483648, %v1763_v2 }
 0x5a3   : > { %v1745_v30 = vmul.f32 %v2338_v17, %v1743_v53  ;;  %2341 = vtanh.f32 %v1719_v16  ;;  %vm1750_vm6 = vweird.f32 %v2338_v17  ;;  %vm1732_vm9 = vmor %vm1730_vm7, %vm1731_vm5  ;;  %vm1769_vm14 = vweird.f32 %v1763_v2 }
 0x5a4   : > { %v1727_v31 = vsub.f32 1.0, %v1726_v29  ;;  %vm1751_vm10 = vmor %vm1749_vm8, %vm1750_vm6  ;;  %v1773_v33 = vand.u32 2147483647, %v1763_v2  ;;  %v1776_v60 = vor.u32 1.1754944e-38, %v1775_v25 }
 0x5a5   : > { %v1746_v32 = vsub.f32 1.0, %v1745_v30 }
 0x5a6   : > { %v1728_v45 = vmul.f32 %v2336_v9, %v1727_v31  ;;  %vm1774_vm0 = vcmp.eq.f32.partialorder %v1773_v33, 8.507059e+37 }
 0x5a7   : > { %v1747_v56 = vmul.f32 %v2338_v17, %v1746_v32 }
 0x5a8   : > { %v2340_v40 = vpop.eup %2339  ;;  %v1729_v20 = vadd.f32 %v2336_v9, %v1728_v45 }
 0x5a9   : > { %v1748_v50 = vadd.f32 %v2338_v17, %v1747_v56  ;;  %v1765_v26 = vmul.f32 %v2340_v40, %v1763_v2  ;;  %v2342_v22 = vpop.eup %2341  ;;  %vm1770_vm13 = vweird.f32 %v2340_v40 }
 0x5aa   : > { %v1733_v46 = vsel %vm1732_vm9, %v2336_v9, %v1729_v20  ;;  %vm1771_vm15 = vmor %vm1769_vm14, %vm1770_vm13 }
 0x5ab   : > { %v1738_v4 = vsel %vm1735_vm11, %v1737_v57, %v1733_v46  ;;  %v1752_v21 = vsel %vm1751_vm10, %v2338_v17, %v1748_v50  ;;  %v1766_v13 = vsub.f32 1.0, %v1765_v26 }
 0x5ac   : > { %v1757_v28 = vsel %vm1754_vm12, %v1756_v3, %v1752_v21  ;;  %v1780_v58 = vmul.f32 %v2342_v22, %v1738_v4 }
 0x5ad   : > { %v1779_v51 = vmul.f32 %v1757_v28, %v3172_v36  ;;  %v1767_v8 = vmul.f32 %v2340_v40, %v1766_v13 }
 0x5af   : > { %v1781_v37 = vadd.f32 %v1780_v58, %v1779_v51  ;;  %v1768_v55 = vadd.f32 %v2340_v40, %v1767_v8 }
 0x5b1   : > { %2343 = vtanh.f32 %v1781_v37  ;;  %1785 = vst [vmem:[#allocation4] sm:$0xff] %v1781_v37  ;;  %v1772_v41 = vsel %vm1771_vm15, %v2340_v40, %v1768_v55 }
 0x5b2   : > { %v1777_v15 = vsel %vm1774_vm0, %v1776_v60, %v1772_v41 }
 0x5b6   : > { %1789 = sbr.rel (%p2143_p9) target bundleno = 1758 (0x6de), region = 64 }
 0x5b7   : > { %v2344_v6 = vpop.eup %2343 }
 0x5b8   : > { %v1783_v7 = vmul.f32 %v2344_v6, %v1777_v15 }
 0x5ba   : > { %1784 = vst [vmem:[#allocation3] sm:$0xff] %v1783_v7 }
 0x5bb   : > { %v1805_v36 = vld [vmem:[#allocation5 + $0x78] sm:$0xff]  ;;  %v1804_v5 = vld [vmem:[#allocation5 + $0x70] sm:$0xff]  ;;  %v1803_v47 = vld [vmem:[#allocation5 + $0x68] sm:$0xff]  ;;  %vm1871_vm1 = vcmask 80896  }
 0x5bc   : > { %1810 = vmatpush.msra.mxu0 %v1805_v36  ;;  %v1802_v63 = vld [vmem:[#allocation5 + $0x60] sm:$0xff]  ;;  %v1846_v0 = vld [vmem:[%s3253_s6 + $0x78] sm:$0xff]  ;;  %v1801_v19 = vld [vmem:[#allocation5 + $0x58] sm:$0xff] }
 0x5bd   : > { %v1845_v43 = vld [vmem:[%s3253_s6 + $0x70] sm:$0xff]  ;;  %1851 = vmatpush.msra.mxu1 %v1846_v0  ;;  %v1844_v10 = vld [vmem:[%s3253_s6 + $0x68] sm:$0xff]  ;;  %v1800_v11 = vld [vmem:[#allocation5 + $0x50] sm:$0xff] }
 0x5be   : > { %1811 = vmatpush.msra.mxu0 %v1804_v5  ;;  %v1843_v14 = vld [vmem:[%s3253_s6 + $0x60] sm:$0xff]  ;;  %v1799_v18 = vld [vmem:[#allocation5 + $0x48] sm:$0xff]  ;;  %v1798_v24 = vld [vmem:[#allocation5 + $0x40] sm:$0xff] }
 0x5bf   : > { %1852 = vmatpush.msra.mxu1 %v1845_v43  ;;  %v1842_v23 = vld [vmem:[%s3253_s6 + $0x58] sm:$0xff]  ;;  %v1841_v27 = vld [vmem:[%s3253_s6 + $0x50] sm:$0xff]  ;;  %v1797_v34 = vld [vmem:[#allocation5 + $0x38] sm:$0xff] }
 0x5c0   : > { %1812 = vmatpush.msra.mxu0 %v1803_v47  ;;  %v1840_v35 = vld [vmem:[%s3253_s6 + $0x48] sm:$0xff]  ;;  %v1796_v38 = vld [vmem:[#allocation5 + $0x30] sm:$0xff]  ;;  %v1795_v48 = vld [vmem:[#allocation5 + $0x28] sm:$0xff] }
 0x5c1   : > { %1853 = vmatpush.msra.mxu1 %v1844_v10  ;;  %v1839_v39 = vld [vmem:[%s3253_s6 + $0x40] sm:$0xff]  ;;  %v1838_v49 = vld [vmem:[%s3253_s6 + $0x38] sm:$0xff]  ;;  %v1794_v52 = vld [vmem:[#allocation5 + $0x20] sm:$0xff] }
 0x5c2   : > { %1813 = vmatpush.msra.mxu0 %v1802_v63  ;;  %v1837_v53 = vld [vmem:[%s3253_s6 + $0x30] sm:$0xff]  ;;  %v1793_v61 = vld [vmem:[#allocation5 + $0x18] sm:$0xff]  ;;  %v1792_v1 = vld [vmem:[#allocation5 + $0x10] sm:$0xff] }
 0x5c3   : > { %1854 = vmatpush.msra.mxu1 %v1843_v14  ;;  %v1836_v62 = vld [vmem:[%s3253_s6 + $0x28] sm:$0xff]  ;;  %v1835_v2 = vld [vmem:[%s3253_s6 + $0x20] sm:$0xff]  ;;  %v1791_v9 = vld [vmem:[#allocation5 + $0x8] sm:$0xff] }
 0x5c4   : > { %1814 = vmatpush.msra.mxu0 %v1801_v19  ;;  %v1834_v12 = vld [vmem:[%s3253_s6 + $0x18] sm:$0xff]  ;;  %v1790_v16 = vld [vmem:[#allocation5] sm:$0xff]  ;;  %v1832_v29 = vld [vmem:[%s3253_s6 + $0x8] sm:$0xff] }
 0x5c5   : > { %1855 = vmatpush.msra.mxu1 %v1842_v23  ;;  %v1833_v17 = vld [vmem:[%s3253_s6 + $0x10] sm:$0xff]  ;;  %v1831_v30 = vld [vmem:[%s3253_s6] sm:$0xff] }
 0x5c6   : > { %1815 = vmatpush.msra.mxu0 %v1800_v11  ;;  %v2345_v31 = vld [vmem:[%s3252_s5] ss:$0 sm:$0xff] }
 0x5c7   : > { %1856 = vmatpush.msra.mxu1 %v1841_v27  ;;  %v2346_v45 = vld [vmem:[%s3254_s7] ss:$0 sm:$0xff] }
 0x5c8   : > { %1816 = vmatpush.msra.mxu0 %v1799_v18 }
 0x5c9   : > { %1857 = vmatpush.msra.mxu1 %v1840_v35 }
 0x5ca   : > { %1817 = vmatpush.msra.mxu0 %v1798_v24 }
 0x5cb   : > { %1858 = vmatpush.msra.mxu1 %v1839_v39 }
 0x5cc   : > { %1818 = vmatpush.msra.mxu0 %v1797_v34 }
 0x5cd   : > { %1859 = vmatpush.msra.mxu1 %v1838_v49 }
 0x5ce   : > { %1819 = vmatpush.msra.mxu0 %v1796_v38 }
 0x5cf   : > { %1860 = vmatpush.msra.mxu1 %v1837_v53 }
 0x5d0   : > { %1820 = vmatpush.msra.mxu0 %v1795_v48 }
 0x5d1   : > { %1861 = vmatpush.msra.mxu1 %v1836_v62 }
 0x5d2   : > { %1821 = vmatpush.msra.mxu0 %v1794_v52 }
 0x5d3   : > { %1862 = vmatpush.msra.mxu1 %v1835_v2 }
 0x5d4   : > { %1822 = vmatpush.msra.mxu0 %v1793_v61 }
 0x5d5   : > { %1863 = vmatpush.msra.mxu1 %v1834_v12 }
 0x5d6   : > { %1823 = vmatpush.msra.mxu0 %v1792_v1 }
 0x5d7   : > { %1864 = vmatpush.msra.mxu1 %v1833_v17 }
 0x5d8   : > { %1824 = vmatpush.msra.mxu0 %v1791_v9 }
 0x5d9   : > { %1865 = vmatpush.msra.mxu1 %v1832_v29 }
 0x5da   : > { %1825 = vmatpush.msra.mxu0 %v1790_v16 }
 0x5db   : > { %1826 = vmatmul.f32.vlgmr.msra.gmra.mxu0 %v1783_v7  ;;  %1866 = vmatpush.msra.mxu1 %v1831_v30 }
 0x658   : > { %v1827_v32 = vpop.f32.mrf.mxu0 }
 0x659   : > { %v1828_v42 = vadd.f32 %v2345_v31, %v1827_v32 }
 0x65b   : > { %v1830_v44 = vmax.f32 %v1828_v42, 0.0 }
 0x65d   : > { %1867 = vmatmul.f32.vlgmr.msra.gmra.mxu1 %v1830_v44 }
 0x6da   : > { %v1868_v54 = vpop.f32.mrf.mxu1 }
 0x6db   : > { %v1869_v56 = vadd.f32 %v2346_v45, %v1868_v54 }
 0x6dd   : > { %1872 = vst.msk [vmem:[%s3255_s8] sm:$0xff] %vm1871_vm1, %v1869_v56 }
 0x6de PF: > { %s19_s29 = sadd.s32 1, %s2403_s29   ;;  %s3300_s27 = smov %s2399_s28 }
 0x6df   : > { %p16_p10 = scmp.ge.s32.totalorder %s19_s29, 4   ;;  %s3301_s28 = smov %s3303_s9 }
 0x6e1   :  { %18 = sbr.rel (!%p16_p10) target bundleno = 2 (0x2), region = 95 }
 0x6e6   :  { %1892 = vsyncpa [#allocation6], 1 }
 0x6e7   :  { %1894 = vsyncpa [#allocation6 + $0x1], 1 }

</bundles_post_ra>
